<compile_context>
chip_gen: v7x
topology: tpu7x:2x2x1
jax: 0.10.0
libtpu: 0.0.40
codegen_flags: <defaults>
</compile_context>

<pallas_src>
import jax
import jax.numpy as jnp
from jax import lax
from jax.experimental import pallas as pl
from jax.experimental.pallas import tpu as pltpu


# NT matmul: contract the last axis of both operands (A @ B^T on the MXU).
_NT_DIMS = (((1,), (1,)), ((), ()))


def _ssa_sp_fused_kernel(x_hw_ref, x_hwt_ref, x_wh_ref, x_nc_ref,
                         wq_ref, wk_ref, wv_ref,
                         bqc_ref, bqr_ref, bk_ref, bv_ref, out_ref):
    """One (batch element, query tile) grid point.

    x_hw_ref  : (1, C, N)   input, HW-ordered columns (keys / channel branch)
    x_hwt_ref : (1, C, TQ)  input, HW-ordered columns of this output tile
    x_wh_ref  : (1, C, N)   input, WH-ordered columns (values / q_wh)
    x_nc_ref  : (1, TQ, C)  input, WH-ordered rows for this query tile
    wq/wk/wv  : (C, C)      1x1-conv weights
    bqc/bk/bv : (C, 1)      biases (column form), bqr: (1, C) bias (row form)
    out_ref   : (1, C, TQ)  output columns [qi*TQ, (qi+1)*TQ)
    """
    f32 = jnp.float32

    x_hw = x_hw_ref[0]      # (C, N)
    x_hwt = x_hwt_ref[0]    # (C, TQ)
    x_wh = x_wh_ref[0]      # (C, N)
    x_nc = x_nc_ref[0]      # (TQ, C)

    wq, wk, wv = wq_ref[...], wk_ref[...], wv_ref[...]
    bq_c, bq_r = bqc_ref[...], bqr_ref[...]
    bk, bv = bk_ref[...], bv_ref[...]

    # Fused 1x1-conv projections; all operands stay (C, .) lane-dense except
    # the small (TQ, C) query-row block.
    q_hw = jnp.dot(wq, x_hw, preferred_element_type=f32) + bq_c    # (C, N)  keys
    k_hw = jnp.dot(wk, x_hw, preferred_element_type=f32) + bk      # (C, N)
    q_wh = jnp.dot(wq, x_wh, preferred_element_type=f32) + bq_c    # (C, N)
    v_wh = jnp.dot(wv, x_wh, preferred_element_type=f32) + bv      # (C, N)  values (WH)
    v_t = jnp.dot(wv, x_hwt, preferred_element_type=f32) + bv      # (C, TQ) values (HW tile)
    # q_rows[m, c] = q_wh[c, col0 + m]  (queries of this tile, row-major)
    q_rows = lax.dot_general(x_nc, wq, _NT_DIMS,
                             preferred_element_type=f32) + bq_r    # (TQ, C)

    # ---- spatial branch (query-tiled; softmax over the full key axis) -----
    # s[m, n] = sum_c q_wh[c, m] * q_hw[c, n]
    s = jnp.dot(q_rows, q_hw, preferred_element_type=f32)          # (TQ, N)
    s = s - jnp.max(s, axis=-1, keepdims=True)
    e = jnp.exp(s)
    p = e * pl.reciprocal(jnp.sum(e, axis=-1, keepdims=True), approx=True)
    # ms^T[c, m] = sum_{m'} v_wh[c, m'] * p[m, m']  -> lane-dense (C, TQ)
    ms_t = lax.dot_general(v_wh, p, _NT_DIMS, preferred_element_type=f32)

    # ---- channel branch ----------------------------------------------------
    # t[c, c'] = sum_n k_hw[c, n] * q_wh[c', n]
    t = lax.dot_general(k_hw, q_wh, _NT_DIMS, preferred_element_type=f32)  # (C, C)
    t = t - jnp.max(t, axis=-1, keepdims=True)
    te = jnp.exp(t)
    tp = te * pl.reciprocal(jnp.sum(te, axis=-1, keepdims=True), approx=True)
    ma = jnp.dot(tp, v_t, preferred_element_type=f32)               # (C, TQ)

    # torch epilogue: ms.transpose(2,1).view(B,C,H,W) + ma.view(B,C,H,W)
    # == raw linear-index add of the WH-ordered ms^T and HW-ordered ma buffers.
    out_ref[0] = (ms_t + ma).astype(out_ref.dtype)


def _pick_query_tile(n):
    # Largest lane-multiple tile that divides N; 256 keeps the (tq, N) score
    # slab small enough for v7x's 64 MiB VMEM at realistic N.
    for t in (256, 128):
        if n % t == 0:
            return t
    return n  # small / irregular N: single full-extent tile


@jax.jit
def ssa_sp_forward(x, w, b):
    """x: (B, C, H, W); w: (3C, C) 1x1-conv weight (squeezed); b: (3C,)."""
    B, C, H, W = x.shape
    N = H * W
    tq = _pick_query_tile(N)
    n_qt = N // tq

    x = x.astype(jnp.float32)
    w = w.astype(jnp.float32)
    b = b.astype(jnp.float32)

    x_hw = x.reshape(B, C, N)                         # [b, c, n=h*W+w]
    x_wh = x.transpose(0, 1, 3, 2).reshape(B, C, N)   # [b, c, m=w*H+h]
    x_nc = x.transpose(0, 3, 2, 1).reshape(B, N, C)   # [b, m=w*H+h, c]

    wq, wk, wv = w[:C], w[C:2 * C], w[2 * C:]
    bq, bk, bv = b[:C], b[C:2 * C], b[2 * C:]
    bq_col = bq.reshape(C, 1)
    bq_row = bq.reshape(1, C)
    bk_col = bk.reshape(C, 1)
    bv_col = bv.reshape(C, 1)

    cn_full = pl.BlockSpec((1, C, N), lambda bi, qi: (bi, 0, 0))
    cn_tile = pl.BlockSpec((1, C, tq), lambda bi, qi: (bi, 0, qi))
    nc_tile = pl.BlockSpec((1, tq, C), lambda bi, qi: (bi, qi, 0))
    w_spec = pl.BlockSpec((C, C), lambda bi, qi: (0, 0))
    bcol_spec = pl.BlockSpec((C, 1), lambda bi, qi: (0, 0))
    brow_spec = pl.BlockSpec((1, C), lambda bi, qi: (0, 0))
    out_spec = pl.BlockSpec((1, C, tq), lambda bi, qi: (bi, 0, qi))

    out_flat = pl.pallas_call(
        _ssa_sp_fused_kernel,
        out_shape=jax.ShapeDtypeStruct((B, C, N), jnp.float32),
        grid=(B, n_qt),
        in_specs=[cn_full, cn_tile, cn_full, nc_tile,
                  w_spec, w_spec, w_spec,
                  bcol_spec, brow_spec, bcol_spec, bcol_spec],
        out_specs=out_spec,
        compiler_params=pltpu.CompilerParams(
            dimension_semantics=("parallel", "parallel"),
            vmem_limit_bytes=32 * 1024 * 1024),
    )(x_hw, x_hw, x_wh, x_nc, wq, wk, wv, bq_col, bq_row, bk_col, bv_col)

    return out_flat.reshape(B, C, H, W)


# ---------------------------------------------------------------------------
# Pure-JAX reference (direct transcription of the torch forward)
# ---------------------------------------------------------------------------
def ssa_sp_reference(x, w, b):
    B, C, H, W = x.shape
    qkv = jnp.einsum("oc,bchw->bohw", w, x) + b.reshape(1, -1, 1, 1)
    q, k, v = qkv[:, :C], qkv[:, C:2 * C], qkv[:, 2 * C:]
    qk = q.transpose(0, 3, 2, 1).reshape(B, -1, C)
    kq = q.reshape(B, C, -1)
    ms = jax.nn.softmax(jnp.matmul(qk, kq), axis=-1)
    k2 = k.reshape(B, C, -1)
    q2 = q.transpose(0, 3, 2, 1).reshape(B, -1, C)
    ma = jax.nn.softmax(jnp.matmul(k2, q2), axis=-1)
    # torch src wraps vq in a 1-tuple by mistake; intended tensor used here.
    vq = v.transpose(0, 3, 2, 1).reshape(B, -1, C)
    vk = v.reshape(B, C, -1)
    ms = jnp.matmul(ms, vq)
    ms = ms.transpose(0, 2, 1)
    ma = jnp.matmul(ma, vk)
    return ms.reshape(B, C, H, W) + ma.reshape(B, C, H, W)


if __name__ == "__main__":
    def run_case(key, B, dim, H, W):
        kx, kw, kb = jax.random.split(key, 3)
        x = jax.random.normal(kx, (B, dim, H, W), dtype=jnp.float32)
        # deterministic Conv2d(dim, 3*dim, 1) params (kaiming-uniform-style bounds)
        bound = 1.0 / (dim ** 0.5)
        w = jax.random.uniform(kw, (3 * dim, dim), jnp.float32, -bound, bound)
        b = jax.random.uniform(kb, (3 * dim,), jnp.float32, -bound, bound)

        out = jax.block_until_ready(ssa_sp_forward(x, w, b))
        ref = ssa_sp_reference(x, w, b)
        assert out.shape == (B, dim, H, W), out.shape
        err = float(jnp.max(jnp.abs(out - ref)))
        assert jnp.allclose(out, ref, rtol=2e-2, atol=5e-3), err

    key = jax.random.PRNGKey(0)
    k1, k2 = jax.random.split(key)
    run_case(k1, B=2, dim=4, H=16, W=16)   # N=256 -> one 256-wide query tile
    run_case(k2, B=1, dim=8, H=8, W=12)    # non-square, N=96 full-extent tile
    print("KERNEL_OK")
</pallas_src>

<mosaic_0001>
module attributes {stable_mosaic.version = 11 : i64} {
  func.func @_ssa_sp_fused_kernel(%arg0: i32, %arg1: i32, %arg2: memref<1x4x256xf32, #tpu.memory_space<vmem>>, %arg3: memref<1x4x256xf32, #tpu.memory_space<vmem>>, %arg4: memref<1x4x256xf32, #tpu.memory_space<vmem>>, %arg5: memref<1x256x4xf32, #tpu.memory_space<vmem>>, %arg6: memref<4x4xf32, #tpu.memory_space<vmem>>, %arg7: memref<4x4xf32, #tpu.memory_space<vmem>>, %arg8: memref<4x4xf32, #tpu.memory_space<vmem>>, %arg9: memref<4x1xf32, #tpu.memory_space<vmem>>, %arg10: memref<1x4xf32, #tpu.memory_space<vmem>>, %arg11: memref<4x1xf32, #tpu.memory_space<vmem>>, %arg12: memref<4x1xf32, #tpu.memory_space<vmem>>, %arg13: memref<1x4x256xf32, #tpu.memory_space<vmem>>) attributes {dimension_semantics = [#tpu.dimension_semantics<parallel>, #tpu.dimension_semantics<parallel>], iteration_bounds = array<i64: 2, 1>, scalar_prefetch = 0 : i64, scratch_operands = 0 : i64, tpu.core_type = #tpu.core_type<tc>, window_params = [{transform_indices = @transform_0, window_bounds = array<i64: 1, 4, 256>}, {transform_indices = @transform_1, window_bounds = array<i64: 1, 4, 256>}, {transform_indices = @transform_2, window_bounds = array<i64: 1, 4, 256>}, {transform_indices = @transform_3, window_bounds = array<i64: 1, 256, 4>}, {pipeline_mode = #tpu.pipeline_mode<synchronous>, transform_indices = @transform_4, window_bounds = array<i64: 4, 4>}, {pipeline_mode = #tpu.pipeline_mode<synchronous>, transform_indices = @transform_5, window_bounds = array<i64: 4, 4>}, {pipeline_mode = #tpu.pipeline_mode<synchronous>, transform_indices = @transform_6, window_bounds = array<i64: 4, 4>}, {pipeline_mode = #tpu.pipeline_mode<synchronous>, transform_indices = @transform_7, window_bounds = array<i64: 4, 1>}, {pipeline_mode = #tpu.pipeline_mode<synchronous>, transform_indices = @transform_8, window_bounds = array<i64: 1, 4>}, {pipeline_mode = #tpu.pipeline_mode<synchronous>, transform_indices = @transform_9, window_bounds = array<i64: 4, 1>}, {pipeline_mode = #tpu.pipeline_mode<synchronous>, transform_indices = @transform_10, window_bounds = array<i64: 4, 1>}, {transform_indices = @transform_11, window_bounds = array<i64: 1, 4, 256>}]} {
    %c0 = arith.constant 0 : index
    %c0_0 = arith.constant 0 : index
    %c0_1 = arith.constant 0 : index
    %0 = vector.load %arg2[%c0, %c0_0, %c0_1] : memref<1x4x256xf32, #tpu.memory_space<vmem>>, vector<1x4x256xf32>
    %1 = vector.shape_cast %0 : vector<1x4x256xf32> to vector<4x256xf32>
    %c0_2 = arith.constant 0 : index
    %c0_3 = arith.constant 0 : index
    %c0_4 = arith.constant 0 : index
    %2 = vector.load %arg3[%c0_2, %c0_3, %c0_4] : memref<1x4x256xf32, #tpu.memory_space<vmem>>, vector<1x4x256xf32>
    %3 = vector.shape_cast %2 : vector<1x4x256xf32> to vector<4x256xf32>
    %c0_5 = arith.constant 0 : index
    %c0_6 = arith.constant 0 : index
    %c0_7 = arith.constant 0 : index
    %4 = vector.load %arg4[%c0_5, %c0_6, %c0_7] : memref<1x4x256xf32, #tpu.memory_space<vmem>>, vector<1x4x256xf32>
    %5 = vector.shape_cast %4 : vector<1x4x256xf32> to vector<4x256xf32>
    %c0_8 = arith.constant 0 : index
    %c0_9 = arith.constant 0 : index
    %c0_10 = arith.constant 0 : index
    %6 = vector.load %arg5[%c0_8, %c0_9, %c0_10] : memref<1x256x4xf32, #tpu.memory_space<vmem>>, vector<1x256x4xf32>
    %7 = vector.shape_cast %6 : vector<1x256x4xf32> to vector<256x4xf32>
    %c0_11 = arith.constant 0 : index
    %c0_12 = arith.constant 0 : index
    %8 = vector.load %arg6[%c0_11, %c0_12] : memref<4x4xf32, #tpu.memory_space<vmem>>, vector<4x4xf32>
    %c0_13 = arith.constant 0 : index
    %c0_14 = arith.constant 0 : index
    %9 = vector.load %arg7[%c0_13, %c0_14] : memref<4x4xf32, #tpu.memory_space<vmem>>, vector<4x4xf32>
    %c0_15 = arith.constant 0 : index
    %c0_16 = arith.constant 0 : index
    %10 = vector.load %arg8[%c0_15, %c0_16] : memref<4x4xf32, #tpu.memory_space<vmem>>, vector<4x4xf32>
    %c0_17 = arith.constant 0 : index
    %c0_18 = arith.constant 0 : index
    %11 = vector.load %arg9[%c0_17, %c0_18] : memref<4x1xf32, #tpu.memory_space<vmem>>, vector<4x1xf32>
    %c0_19 = arith.constant 0 : index
    %c0_20 = arith.constant 0 : index
    %12 = vector.load %arg10[%c0_19, %c0_20] : memref<1x4xf32, #tpu.memory_space<vmem>>, vector<1x4xf32>
    %c0_21 = arith.constant 0 : index
    %c0_22 = arith.constant 0 : index
    %13 = vector.load %arg11[%c0_21, %c0_22] : memref<4x1xf32, #tpu.memory_space<vmem>>, vector<4x1xf32>
    %c0_23 = arith.constant 0 : index
    %c0_24 = arith.constant 0 : index
    %14 = vector.load %arg12[%c0_23, %c0_24] : memref<4x1xf32, #tpu.memory_space<vmem>>, vector<4x1xf32>
    %cst = arith.constant dense<0.000000e+00> : vector<4x256xf32>
    %15 = tpu.matmul %8, %1, %cst {dimension_numbers = #tpu.dot_dimension_numbers<[1], [0], [0], [1], [0, 0, 1, 1], [], []>} : vector<4x4xf32>, vector<4x256xf32>, vector<4x256xf32> -> vector<4x256xf32>
    %16 = vector.broadcast %11 : vector<4x1xf32> to vector<4x256xf32>
    %17 = arith.addf %15, %16 : vector<4x256xf32>
    %cst_25 = arith.constant dense<0.000000e+00> : vector<4x256xf32>
    %18 = tpu.matmul %9, %1, %cst_25 {dimension_numbers = #tpu.dot_dimension_numbers<[1], [0], [0], [1], [0, 0, 1, 1], [], []>} : vector<4x4xf32>, vector<4x256xf32>, vector<4x256xf32> -> vector<4x256xf32>
    %19 = vector.broadcast %13 : vector<4x1xf32> to vector<4x256xf32>
    %20 = arith.addf %18, %19 : vector<4x256xf32>
    %cst_26 = arith.constant dense<0.000000e+00> : vector<4x256xf32>
    %21 = tpu.matmul %8, %5, %cst_26 {dimension_numbers = #tpu.dot_dimension_numbers<[1], [0], [0], [1], [0, 0, 1, 1], [], []>} : vector<4x4xf32>, vector<4x256xf32>, vector<4x256xf32> -> vector<4x256xf32>
    %22 = vector.broadcast %11 : vector<4x1xf32> to vector<4x256xf32>
    %23 = arith.addf %21, %22 : vector<4x256xf32>
    %cst_27 = arith.constant dense<0.000000e+00> : vector<4x256xf32>
    %24 = tpu.matmul %10, %5, %cst_27 {dimension_numbers = #tpu.dot_dimension_numbers<[1], [0], [0], [1], [0, 0, 1, 1], [], []>} : vector<4x4xf32>, vector<4x256xf32>, vector<4x256xf32> -> vector<4x256xf32>
    %25 = vector.broadcast %14 : vector<4x1xf32> to vector<4x256xf32>
    %26 = arith.addf %24, %25 : vector<4x256xf32>
    %cst_28 = arith.constant dense<0.000000e+00> : vector<4x256xf32>
    %27 = tpu.matmul %10, %3, %cst_28 {dimension_numbers = #tpu.dot_dimension_numbers<[1], [0], [0], [1], [0, 0, 1, 1], [], []>} : vector<4x4xf32>, vector<4x256xf32>, vector<4x256xf32> -> vector<4x256xf32>
    %28 = vector.broadcast %14 : vector<4x1xf32> to vector<4x256xf32>
    %29 = arith.addf %27, %28 : vector<4x256xf32>
    %cst_29 = arith.constant dense<0.000000e+00> : vector<256x4xf32>
    %30 = tpu.matmul %7, %8, %cst_29 {dimension_numbers = #tpu.dot_dimension_numbers<[1], [1], [0], [0], [0, 0, 1, 0], [], []>} : vector<256x4xf32>, vector<4x4xf32>, vector<256x4xf32> -> vector<256x4xf32>
    %31 = vector.broadcast %12 : vector<1x4xf32> to vector<256x4xf32>
    %32 = arith.addf %30, %31 : vector<256x4xf32>
    %cst_30 = arith.constant dense<0.000000e+00> : vector<256x256xf32>
    %33 = tpu.matmul %32, %17, %cst_30 {dimension_numbers = #tpu.dot_dimension_numbers<[1], [0], [0], [1], [0, 0, 1, 1], [], []>} : vector<256x4xf32>, vector<4x256xf32>, vector<256x256xf32> -> vector<256x256xf32>
    %cst_31 = arith.constant dense<0xFF800000> : vector<256xf32>
    %34 = vector.multi_reduction <maximumf>, %33, %cst_31 [1] : vector<256x256xf32> to vector<256xf32>
    %35 = vector.shape_cast %34 : vector<256xf32> to vector<256x1xf32>
    %36 = vector.broadcast %35 : vector<256x1xf32> to vector<256x256xf32>
    %37 = arith.subf %33, %36 : vector<256x256xf32>
    %38 = math.exp %37 : vector<256x256xf32>
    %cst_32 = arith.constant dense<0.000000e+00> : vector<256xf32>
    %39 = vector.multi_reduction <add>, %38, %cst_32 [1] : vector<256x256xf32> to vector<256xf32>
    %40 = vector.shape_cast %39 : vector<256xf32> to vector<256x1xf32>
    %41 = tpu.reciprocal %40 {approx = true} : vector<256x1xf32> -> vector<256x1xf32>
    %42 = vector.broadcast %41 : vector<256x1xf32> to vector<256x256xf32>
    %43 = arith.mulf %38, %42 : vector<256x256xf32>
    %cst_33 = arith.constant dense<0.000000e+00> : vector<4x256xf32>
    %44 = tpu.matmul %26, %43, %cst_33 {dimension_numbers = #tpu.dot_dimension_numbers<[1], [1], [0], [0], [0, 0, 1, 0], [], []>} : vector<4x256xf32>, vector<256x256xf32>, vector<4x256xf32> -> vector<4x256xf32>
    %cst_34 = arith.constant dense<0.000000e+00> : vector<4x4xf32>
    %45 = tpu.matmul %20, %23, %cst_34 {dimension_numbers = #tpu.dot_dimension_numbers<[1], [1], [0], [0], [0, 0, 1, 0], [], []>} : vector<4x256xf32>, vector<4x256xf32>, vector<4x4xf32> -> vector<4x4xf32>
    %cst_35 = arith.constant dense<0xFF800000> : vector<4xf32>
    %46 = vector.multi_reduction <maximumf>, %45, %cst_35 [1] : vector<4x4xf32> to vector<4xf32>
    %47 = vector.shape_cast %46 : vector<4xf32> to vector<4x1xf32>
    %48 = vector.broadcast %47 : vector<4x1xf32> to vector<4x4xf32>
    %49 = arith.subf %45, %48 : vector<4x4xf32>
    %50 = math.exp %49 : vector<4x4xf32>
    %cst_36 = arith.constant dense<0.000000e+00> : vector<4xf32>
    %51 = vector.multi_reduction <add>, %50, %cst_36 [1] : vector<4x4xf32> to vector<4xf32>
    %52 = vector.shape_cast %51 : vector<4xf32> to vector<4x1xf32>
    %53 = tpu.reciprocal %52 {approx = true} : vector<4x1xf32> -> vector<4x1xf32>
    %54 = vector.broadcast %53 : vector<4x1xf32> to vector<4x4xf32>
    %55 = arith.mulf %50, %54 : vector<4x4xf32>
    %cst_37 = arith.constant dense<0.000000e+00> : vector<4x256xf32>
    %56 = tpu.matmul %55, %29, %cst_37 {dimension_numbers = #tpu.dot_dimension_numbers<[1], [0], [0], [1], [0, 0, 1, 1], [], []>} : vector<4x4xf32>, vector<4x256xf32>, vector<4x256xf32> -> vector<4x256xf32>
    %57 = arith.addf %44, %56 : vector<4x256xf32>
    %c0_38 = arith.constant 0 : index
    %c0_39 = arith.constant 0 : index
    %c0_40 = arith.constant 0 : index
    %58 = vector.load %arg13[%c0_38, %c0_39, %c0_40] : memref<1x4x256xf32, #tpu.memory_space<vmem>>, vector<1x4x256xf32>
    %59 = vector.shape_cast %58 : vector<1x4x256xf32> to vector<4x256xf32>
    %60 = vector.shape_cast %57 : vector<4x256xf32> to vector<1x4x256xf32>
    tpu.vector_store %arg13[%c0_38, %c0_39, %c0_40], %60 {strides = array<i32>} : memref<1x4x256xf32, #tpu.memory_space<vmem>>, vector<1x4x256xf32>,
    return
  }
  func.func @transform_0(%arg0: i32, %arg1: i32) -> (i32, i32, i32) {
    %c0_i32 = arith.constant 0 : i32
    %c0_i32_0 = arith.constant 0 : i32
    %c0_i32_1 = arith.constant 0 : i32
    return %arg0, %c0_i32, %c0_i32_0 : i32, i32, i32
  }
  func.func @transform_1(%arg0: i32, %arg1: i32) -> (i32, i32, i32) {
    %c0_i32 = arith.constant 0 : i32
    %c0_i32_0 = arith.constant 0 : i32
    return %arg0, %c0_i32, %arg1 : i32, i32, i32
  }
  func.func @transform_2(%arg0: i32, %arg1: i32) -> (i32, i32, i32) {
    %c0_i32 = arith.constant 0 : i32
    %c0_i32_0 = arith.constant 0 : i32
    %c0_i32_1 = arith.constant 0 : i32
    return %arg0, %c0_i32, %c0_i32_0 : i32, i32, i32
  }
  func.func @transform_3(%arg0: i32, %arg1: i32) -> (i32, i32, i32) {
    %c0_i32 = arith.constant 0 : i32
    %c0_i32_0 = arith.constant 0 : i32
    return %arg0, %arg1, %c0_i32 : i32, i32, i32
  }
  func.func @transform_4(%arg0: i32, %arg1: i32) -> (i32, i32) {
    %c0_i32 = arith.constant 0 : i32
    %c0_i32_0 = arith.constant 0 : i32
    %c0_i32_1 = arith.constant 0 : i32
    return %c0_i32, %c0_i32_0 : i32, i32
  }
  func.func @transform_5(%arg0: i32, %arg1: i32) -> (i32, i32) {
    %c0_i32 = arith.constant 0 : i32
    %c0_i32_0 = arith.constant 0 : i32
    %c0_i32_1 = arith.constant 0 : i32
    return %c0_i32, %c0_i32_0 : i32, i32
  }
  func.func @transform_6(%arg0: i32, %arg1: i32) -> (i32, i32) {
    %c0_i32 = arith.constant 0 : i32
    %c0_i32_0 = arith.constant 0 : i32
    %c0_i32_1 = arith.constant 0 : i32
    return %c0_i32, %c0_i32_0 : i32, i32
  }
  func.func @transform_7(%arg0: i32, %arg1: i32) -> (i32, i32) {
    %c0_i32 = arith.constant 0 : i32
    %c0_i32_0 = arith.constant 0 : i32
    %c0_i32_1 = arith.constant 0 : i32
    return %c0_i32, %c0_i32_0 : i32, i32
  }
  func.func @transform_8(%arg0: i32, %arg1: i32) -> (i32, i32) {
    %c0_i32 = arith.constant 0 : i32
    %c0_i32_0 = arith.constant 0 : i32
    %c0_i32_1 = arith.constant 0 : i32
    return %c0_i32, %c0_i32_0 : i32, i32
  }
  func.func @transform_9(%arg0: i32, %arg1: i32) -> (i32, i32) {
    %c0_i32 = arith.constant 0 : i32
    %c0_i32_0 = arith.constant 0 : i32
    %c0_i32_1 = arith.constant 0 : i32
    return %c0_i32, %c0_i32_0 : i32, i32
  }
  func.func @transform_10(%arg0: i32, %arg1: i32) -> (i32, i32) {
    %c0_i32 = arith.constant 0 : i32
    %c0_i32_0 = arith.constant 0 : i32
    %c0_i32_1 = arith.constant 0 : i32
    return %c0_i32, %c0_i32_0 : i32, i32
  }
  func.func @transform_11(%arg0: i32, %arg1: i32) -> (i32, i32, i32) {
    %c0_i32 = arith.constant 0 : i32
    %c0_i32_0 = arith.constant 0 : i32
    return %arg0, %c0_i32, %arg1 : i32, i32, i32
  }
}

</mosaic_0001>

<bundles_post_ra>
// kernel: ssa_sp_forward.1
= control target key start
LH: loop header
LB: loop body
LE: loop exit
PB: predicated region body
PF: predicated region fallthrough
CT: control target
= control target key end

     0   :  { %s3046_s17 = smov 0   ;;  %s3048_s18 = smov 0   ;;  %s3869_s0 = inlined_call_operand.vmem [shape: f32[2,4,256], index: 0, kind: input, shape index: {}, may-alias: {0,1}]   ;;  %s3870_s1 = inlined_call_operand.vmem [shape: f32[2,4,256], index: 1, kind: input, shape index: {}, may-alias: {0,1}]   ;;  %s3871_s2 = inlined_call_operand.vmem [shape: f32[2,4,256], index: 2, kind: input, shape index: {}]   ;;  %s3872_s3 = inlined_call_operand.vmem [shape: f32[2,256,4], index: 3, kind: input, shape index: {}]   ;;  %s3873_s4 = inlined_call_operand.vmem [shape: f32[4,4], index: 4, kind: input, shape index: {}]   ;;  %s3874_s5 = inlined_call_operand.vmem [shape: f32[4,4], index: 5, kind: input, shape index: {}]   ;;  %s3875_s6 = inlined_call_operand.vmem [shape: f32[4,4], index: 6, kind: input, shape index: {}]   ;;  %s3876_s7 = inlined_call_operand.vmem [shape: f32[4,1], index: 7, kind: input, shape index: {}]   ;;  %s3877_s8 = inlined_call_operand.vmem [shape: f32[1,4], index: 8, kind: input, shape index: {}]   ;;  %s3878_s9 = inlined_call_operand.vmem [shape: f32[4,1], index: 9, kind: input, shape index: {}]   ;;  %s3879_s10 = inlined_call_operand.vmem [shape: f32[4,1], index: 10, kind: input, shape index: {}]   ;;  %s3880_s11 = inlined_call_operand.vmem [shape: f32[2,4,256], index: 11, kind: output, shape index: {}]  }
   0x1   :  { %s3050_s19 = smov 0  }
   0x2 LB: > { %s33_s20 = sadd.s32 1, %s2978_s18  ;;  %p2480_p0 = scmp.ge.s32.totalorder %s2982_s19, 1  ;;  %s2982_s19 = sphi %s3050_s19, %s21_s19   ;;  %s2978_s18 = sphi %s3048_s18, %s3985_s18   ;;  %s2974_s17 = sphi %s3046_s17, %s3984_s17  }
   0x3   : > { %p35_p1 = scmp.ge.s32.totalorder %s33_s20, 2  ;;  %p395_p2 = scmp.lt.s32.totalorder %s2982_s19, 3 }
   0x5   : > { %s3987_s20 = smov (%p35_p1, %s33_s20), 0  ;;  %p396_p3 = pnand %p2480_p0, %p395_p2 }
   0x7   : > { %399 = sbr.rel (%p396_p3) target bundleno = 1212 (0x4bc), region = 64 }
   0xe   : > { %p462_p4 = scmp.lt.s32.totalorder %s2974_s17, 1  ;;  %v2984_v0 = vmov 0.0   ;;  %v2985_v1 = vmov 0   ;;  %v540_v2 = vld [vmem:[%s3876_s7] sm:$0xf]  ;;  %vm555_vm0 = vcmask 1043456  }
   0xf   : > { %624 = vmatprep.mubr.f32.mxu1 %v2984_v0  ;;  %1436 = vmatprep.mubr.f32.mxu0 %v2984_v0  ;;  %v542_v3 = vld [vmem:[%s3878_s9] sm:$0xf]  ;;  %vm551_vm1 = vcmask 31744   ;;  %vm2179_vm2 = vcmask 27648  }
  0x10   : > { %s3989_s17 = smov (!%p462_p4, %s2974_s17), 1  ;;  %2759 = vset.pattern.permute.xlu0 %v2985_v1  ;;  %2760 = vset.pattern.permute.xlu1 %v2985_v1  ;;  %v537_v7 = vld [vmem:[%s3873_s4] sm:$0xf] }
  0x11   : > { %546 = vperm.xlu0 %2759, %v540_v2   ;;  %s3072_s23 = sshll.u32 %s3989_s17, 3  ;;  %v538_v9 = vld [vmem:[%s3874_s5] sm:$0xf]  ;;  %s2582_s25 = sshll.u32 %s3989_s17, 8 }
  0x12   : > { %s466_s28 = scalar_lea.vmem %s3869_s0, %s3072_s23  ;;  %s481_s12 = scalar_lea.vmem %s3871_s2, %s3072_s23  ;;  %v539_v12 = vld [vmem:[%s3875_s6] sm:$0xf] }
  0x13   : > { %v502_v4 = vld [vmem:[%s466_s28] sm:$0xff]  ;;  %s475_s21 = scalar_lea.vmem %s3870_s1, %s3072_s23  ;;  %s3117_s30 = scalar_lea.vmem %s3872_s3, %s2582_s25 }
  0x14   : > { %v550_v5 = vcombine.high %v502_v4, %v502_v4  ;;  %v504_v6 = vld [vmem:[%s481_s12] sm:$0xff]  ;;  %v506_v14 = vld [vmem:[%s3117_s30 + $0x8] sm:$0xff]  ;;  %v507_v15 = vld [vmem:[%s3117_s30 + $0x10] sm:$0xff] }
  0x15   : > { %633 = vperm.xlu0 %2759, %v542_v3   ;;  %v711_v8 = vcombine.high %v504_v6, %v504_v6  ;;  %v503_v10 = vld [vmem:[%s475_s21] sm:$0xff]  ;;  %v508_v16 = vld [vmem:[%s3117_s30 + $0x18] sm:$0xff]  ;;  %v510_v18 = vld [vmem:[%s3117_s30 + $0x28] sm:$0xff]  ;;  %s500_s21 = scalar_lea.vmem %s3880_s11, %s3072_s23 }
  0x16   : > { %2491 = vmatprep.subr.msk.mxu1 %vm555_vm0, %v550_v5  ;;  %v867_v11 = vcombine.high %v503_v10, %v503_v10  ;;  %v505_v13 = vld [vmem:[%s3117_s30] sm:$0xff]  ;;  %v511_v19 = vld [vmem:[%s3117_s30 + $0x30] sm:$0xff]  ;;  %v512_v20 = vld [vmem:[%s3117_s30 + $0x38] sm:$0xff] }
  0x17   : > { %2492 = vmatpush1.msk.msra.mxu1 %vm555_vm0, %v502_v4  ;;  %v509_v17 = vld [vmem:[%s3117_s30 + $0x20] sm:$0xff]  ;;  %v514_v22 = vld [vmem:[%s3117_s30 + $0x48] sm:$0xff]  ;;  %v515_v23 = vld [vmem:[%s3117_s30 + $0x50] sm:$0xff] }
  0x18   : > { %2493 = vmatmul.mubr.msk.f32.vlgmr.msra.gmra.mrb[0].mxu1 %vm551_vm1, %v537_v7  ;;  %2494 = vmatprep.subr.msk.mxu1 %vm555_vm0, %v550_v5  ;;  %v513_v21 = vld [vmem:[%s3117_s30 + $0x40] sm:$0xff]  ;;  %v516_v24 = vld [vmem:[%s3117_s30 + $0x58] sm:$0xff]  ;;  %v518_v26 = vld [vmem:[%s3117_s30 + $0x68] sm:$0xff] }
  0x19   : > { %2495 = vmatpush1.msk.msra.mxu1 %vm555_vm0, %v502_v4  ;;  %703 = vmatprep.mubr.f32.mxu1 %v2984_v0  ;;  %v517_v25 = vld [vmem:[%s3117_s30 + $0x60] sm:$0xff]  ;;  %v519_v27 = vld [vmem:[%s3117_s30 + $0x70] sm:$0xff]  ;;  %v520_v28 = vld [vmem:[%s3117_s30 + $0x78] sm:$0xff] }
  0x1a   : > { %2497 = vmatprep.subr.msk.mxu1 %vm555_vm0, %v711_v8  ;;  %v521_v29 = vld [vmem:[%s3117_s30 + $0x80] sm:$0xff]  ;;  %v522_v30 = vld [vmem:[%s3117_s30 + $0x88] sm:$0xff]  ;;  %v523_v31 = vld [vmem:[%s3117_s30 + $0x90] sm:$0xff] }
  0x1b   : > { %v524_v32 = vld [vmem:[%s3117_s30 + $0x98] sm:$0xff]  ;;  %v525_v33 = vld [vmem:[%s3117_s30 + $0xa0] sm:$0xff]  ;;  %v526_v34 = vld [vmem:[%s3117_s30 + $0xa8] sm:$0xff] }
  0x1c   : > { %2496 = vmatmul.mubr.msk.f32.vlgmr.msra.gmra.mrb[2].mxu1 %vm551_vm1, %v538_v9  ;;  %v527_v35 = vld [vmem:[%s3117_s30 + $0xb0] sm:$0xff]  ;;  %v528_v36 = vld [vmem:[%s3117_s30 + $0xb8] sm:$0xff]  ;;  %v529_v37 = vld [vmem:[%s3117_s30 + $0xc0] sm:$0xff] }
  0x1d   : > { %2498 = vmatpush1.msk.msra.mxu1 %vm555_vm0, %v504_v6  ;;  %780 = vmatprep.mubr.f32.mxu1 %v2984_v0  ;;  %v530_v38 = vld [vmem:[%s3117_s30 + $0xc8] sm:$0xff]  ;;  %v531_v39 = vld [vmem:[%s3117_s30 + $0xd0] sm:$0xff]  ;;  %v532_v40 = vld [vmem:[%s3117_s30 + $0xd8] sm:$0xff] }
  0x1e   : > { %2500 = vmatprep.subr.msk.mxu1 %vm555_vm0, %v711_v8  ;;  %v533_v41 = vld [vmem:[%s3117_s30 + $0xe0] sm:$0xff]  ;;  %v534_v42 = vld [vmem:[%s3117_s30 + $0xe8] sm:$0xff]  ;;  %v535_v43 = vld [vmem:[%s3117_s30 + $0xf0] sm:$0xff] }
  0x1f   : > { %v536_v44 = vld [vmem:[%s3117_s30 + $0xf8] sm:$0xff]  ;;  %v3203_v63 = vld [vmem:[%s3877_s8] ss:$0 sm:$0xff] }
  0x20   : > { %2499 = vmatmul.mubr.msk.f32.vlgmr.msra.gmra.mrb[4].mxu1 %vm551_vm1, %v537_v7 }
  0x21   : > { %2501 = vmatpush1.msk.msra.mxu1 %vm555_vm0, %v504_v6  ;;  %859 = vmatprep.mubr.f32.mxu1 %v2984_v0 }
  0x22   : > { %2503 = vmatprep.subr.msk.mxu1 %vm555_vm0, %v867_v11 }
  0x24   : > { %2502 = vmatmul.mubr.msk.f32.vlgmr.msra.gmra.mrb[6].mxu1 %vm551_vm1, %v539_v12 }
  0x25   : > { %2504 = vmatpush1.msk.msra.mxu1 %vm555_vm0, %v503_v10  ;;  %936 = vmatprep.mubr.f32.mxu1 %v2984_v0 }
  0x26   : > { %2617 = vmatprep.subr.msk.mxu1 %vm551_vm1, %v537_v7 }
  0x28   : > { %2505 = vmatmul.mubr.msk.f32.vlgmr.msra.gmra.mrb[8].mxu1 %vm551_vm1, %v539_v12 }
  0x29   : > { %2619 = vmatprep.mubr.msk.f32.mxu1 %vm551_vm1, %v505_v13 }
  0x2c   : > { %2618 = vmatpush3.xpose.msk.msra.mxu1 %vm551_vm1, %v537_v7 }
  0x2f   : > { %2620 = vmatmul.mubr.msk.f32.vlgmr.msra.gmra.mrb[10].mxu1 %vm551_vm1, %v506_v14 }
  0x30   : > { %2622 = vmatprep.mubr.msk.f32.mxu1 %vm551_vm1, %v507_v15 }
  0x33   : > { %2623 = vmatmul.mubr.msk.f32.gmra.mrb[12].mxu1 %vm551_vm1, %v508_v16 }
  0x34   : > { %2625 = vmatprep.mubr.msk.f32.mxu1 %vm551_vm1, %v509_v17 }
  0x37   : > { %2626 = vmatmul.mubr.msk.f32.gmra.mrb[14].mxu1 %vm551_vm1, %v510_v18 }
  0x38   : > { %2628 = vmatprep.mubr.msk.f32.mxu1 %vm551_vm1, %v511_v19 }
  0x3b   : > { %2629 = vmatmul.mubr.msk.f32.gmra.mrb[16].mxu1 %vm551_vm1, %v512_v20 }
  0x3c   : > { %2631 = vmatprep.mubr.msk.f32.mxu1 %vm551_vm1, %v513_v21 }
  0x3f   : > { %2632 = vmatmul.mubr.msk.f32.gmra.mrb[18].mxu1 %vm551_vm1, %v514_v22 }
  0x40   : > { %2634 = vmatprep.mubr.msk.f32.mxu1 %vm551_vm1, %v515_v23 }
  0x43   : > { %2635 = vmatmul.mubr.msk.f32.gmra.mrb[20].mxu1 %vm551_vm1, %v516_v24 }
  0x44   : > { %2637 = vmatprep.mubr.msk.f32.mxu1 %vm551_vm1, %v517_v25 }
  0x47   : > { %2638 = vmatmul.mubr.msk.f32.gmra.mrb[22].mxu1 %vm551_vm1, %v518_v26 }
  0x48   : > { %2640 = vmatprep.mubr.msk.f32.mxu1 %vm551_vm1, %v519_v27 }
  0x4b   : > { %2641 = vmatmul.mubr.msk.f32.gmra.mrb[24].mxu1 %vm551_vm1, %v520_v28 }
  0x4c   : > { %2643 = vmatprep.mubr.msk.f32.mxu1 %vm551_vm1, %v521_v29 }
  0x4f   : > { %2644 = vmatmul.mubr.msk.f32.gmra.mrb[26].mxu1 %vm551_vm1, %v522_v30 }
  0x50   : > { %2646 = vmatprep.mubr.msk.f32.mxu1 %vm551_vm1, %v523_v31 }
  0x53   : > { %2647 = vmatmul.mubr.msk.f32.gmra.mrb[28].mxu1 %vm551_vm1, %v524_v32 }
  0x54   : > { %2649 = vmatprep.mubr.msk.f32.mxu1 %vm551_vm1, %v525_v33 }
  0x57   : > { %2650 = vmatmul.mubr.msk.f32.gmra.mrb[30].mxu1 %vm551_vm1, %v526_v34 }
  0x58   : > { %2652 = vmatprep.mubr.msk.f32.mxu1 %vm551_vm1, %v527_v35 }
  0x5b   : > { %2653 = vmatmul.mubr.msk.f32.gmra.mrb[32].mxu1 %vm551_vm1, %v528_v36 }
  0x5c   : > { %2655 = vmatprep.mubr.msk.f32.mxu1 %vm551_vm1, %v529_v37 }
  0x5f   : > { %2656 = vmatmul.mubr.msk.f32.gmra.mrb[34].mxu1 %vm551_vm1, %v530_v38 }
  0x60   : > { %2658 = vmatprep.mubr.msk.f32.mxu1 %vm551_vm1, %v531_v39 }
  0x63   : > { %2659 = vmatmul.mubr.msk.f32.gmra.mrb[36].mxu1 %vm551_vm1, %v532_v40 }
  0x64   : > { %2661 = vmatprep.mubr.msk.f32.mxu1 %vm551_vm1, %v533_v41 }
  0x67   : > { %2662 = vmatmul.mubr.msk.f32.gmra.mrb[38].mxu1 %vm551_vm1, %v534_v42 }
  0x68   : > { %2664 = vmatprep.mubr.msk.f32.mxu1 %vm551_vm1, %v535_v43 }
  0x6b   : > { %2665 = vmatmul.mubr.msk.f32.gmra.mrb[40].mxu1 %vm551_vm1, %v536_v44 }
  0x90   : > { %v547_v45 = vpop.permute.xlu0 %546 }
  0x94   : > { %v634_v50 = vpop.permute.xlu0 %633 }
  0xeb   : > { %v626_v46 = vpop.f32.mrb[0].mxu1 }
  0xec   : > { %v628_v47 = vpop.f32.mrb[1].mxu1  ;;  %v627_v49 = vadd.f32 %v626_v46, %v547_v45 }
  0xed   : > { %v629_v48 = vadd.f32 %v628_v47, %v547_v45 }
  0xef   : > { %v705_v51 = vpop.f32.mrb[2].mxu1  ;;  %2540 = vmatprep.subr.msk.mxu0 %vm555_vm0, %v629_v48 }
  0xf0   : > { %v707_v52 = vpop.f32.mrb[3].mxu1  ;;  %2541 = vmatpush1.msk.msra.mxu0 %vm555_vm0, %v627_v49  ;;  %v706_v60 = vadd.f32 %v705_v51, %v634_v50 }
  0xf1   : > { %v708_v53 = vadd.f32 %v707_v52, %v634_v50 }
  0xf3   : > { %v782_v54 = vpop.f32.mrb[4].mxu1  ;;  %2173 = vmatprep.mubr.f32.mxu1 %v708_v53 }
  0xf4   : > { %v784_v55 = vpop.f32.mrb[5].mxu1  ;;  %v783_v57 = vadd.f32 %v782_v54, %v547_v45 }
  0xf5   : > { %v785_v56 = vadd.f32 %v784_v55, %v547_v45 }
  0xf7   : > { %v3191_v58 = vpop.f32.mrb[6].mxu1  ;;  %2109 = vmatprep.subr.mxu1 %v785_v56 }
  0xf8   : > { %3910 = vst [vmem:[#allocation2_spill] sm:$0xff] %v3191_v58  ;;  %v3193_v59 = vpop.f32.mrb[7].mxu1  ;;  %2110 = vmatpush1.xpose.msra.mxu1 %v783_v57 }
  0xf9   : > { %3911 = vst [vmem:[#allocation3_spill] sm:$0xff] %v3193_v59 }
  0xfb   : > { %2174 = vmatmul.mubr.f32.vlgmr.msra.gmra.mrb[42].mxu1 %v706_v60  ;;  %v3195_v61 = vpop.f32.mrb[8].mxu1 }
  0xfc   : > { %3912 = vst [vmem:[#allocation4_spill] sm:$0xff] %v3195_v61  ;;  %v3197_v62 = vpop.f32.mrb[9].mxu1  ;;  %2264 = vmatprep.mubr.f32.mxu1 %v2984_v0 }
  0xfd   : > { %3913 = vst [vmem:[#allocation5_spill] sm:$0xff] %v3197_v62 }
 0x102   : > { %v2621_v1 = vpop.f32.mrb[10].mxu1 }
 0x103   : > { %v1111_v2 = vpop.f32.mrb[11].mxu1  ;;  %v1117_v6 = vadd.f32 %v2621_v1, %v3203_v63 }
 0x104   : > { %v1112_v3 = vadd.f32 %v3203_v63, %v1111_v2 }
 0x106   : > { %2542 = vmatmul.mubr.msk.f32.vlgmr.msra.gmra.mrb[0].mxu0 %vm551_vm1, %v1112_v3  ;;  %v2624_v4 = vpop.f32.mrb[12].mxu1 }
 0x107   : > { %1442 = vmatprep.mubr.f32.mxu0 %v2984_v0  ;;  %v1121_v5 = vpop.f32.mrb[13].mxu1  ;;  %v1127_v12 = vadd.f32 %v2624_v4, %v3203_v63 }
 0x108   : > { %v1122_v7 = vadd.f32 %v3203_v63, %v1121_v5 }
 0x10a   : > { %2543 = vmatmul.mubr.msk.f32.gmra.mrb[2].mxu0 %vm551_vm1, %v1117_v6  ;;  %v2627_v8 = vpop.f32.mrb[14].mxu1 }
 0x10b   : > { %1448 = vmatprep.mubr.f32.mxu0 %v2984_v0  ;;  %v1131_v9 = vpop.f32.mrb[15].mxu1  ;;  %v1137_v18 = vadd.f32 %v2627_v8, %v3203_v63 }
 0x10c   : > { %v1132_v13 = vadd.f32 %v3203_v63, %v1131_v9 }
 0x10e   : > { %2544 = vmatmul.mubr.msk.f32.gmra.mrb[4].mxu0 %vm551_vm1, %v1122_v7  ;;  %v2630_v10 = vpop.f32.mrb[16].mxu1 }
 0x10f   : > { %1454 = vmatprep.mubr.f32.mxu0 %v2984_v0  ;;  %v1141_v11 = vpop.f32.mrb[17].mxu1  ;;  %v1147_v24 = vadd.f32 %v2630_v10, %v3203_v63 }
 0x110   : > { %v1142_v19 = vadd.f32 %v3203_v63, %v1141_v11 }
 0x112   : > { %2545 = vmatmul.mubr.msk.f32.gmra.mrb[6].mxu0 %vm551_vm1, %v1127_v12  ;;  %v2633_v14 = vpop.f32.mrb[18].mxu1 }
 0x113   : > { %1460 = vmatprep.mubr.f32.mxu0 %v2984_v0  ;;  %v1151_v15 = vpop.f32.mrb[19].mxu1  ;;  %v1157_v33 = vadd.f32 %v2633_v14, %v3203_v63 }
 0x114   : > { %v1152_v25 = vadd.f32 %v3203_v63, %v1151_v15 }
 0x116   : > { %2546 = vmatmul.mubr.msk.f32.gmra.mrb[8].mxu0 %vm551_vm1, %v1132_v13  ;;  %v2636_v16 = vpop.f32.mrb[20].mxu1 }
 0x117   : > { %1466 = vmatprep.mubr.f32.mxu0 %v2984_v0  ;;  %v1161_v17 = vpop.f32.mrb[21].mxu1  ;;  %v1167_v43 = vadd.f32 %v2636_v16, %v3203_v63 }
 0x118   : > { %v1162_v35 = vadd.f32 %v3203_v63, %v1161_v17 }
 0x11a   : > { %2547 = vmatmul.mubr.msk.f32.gmra.mrb[10].mxu0 %vm551_vm1, %v1137_v18  ;;  %v2639_v20 = vpop.f32.mrb[22].mxu1 }
 0x11b   : > { %1472 = vmatprep.mubr.f32.mxu0 %v2984_v0  ;;  %v1171_v21 = vpop.f32.mrb[23].mxu1  ;;  %v1177_v50 = vadd.f32 %v2639_v20, %v3203_v63 }
 0x11c   : > { %v1172_v45 = vadd.f32 %v3203_v63, %v1171_v21 }
 0x11e   : > { %2548 = vmatmul.mubr.msk.f32.gmra.mrb[12].mxu0 %vm551_vm1, %v1142_v19  ;;  %v2642_v22 = vpop.f32.mrb[24].mxu1 }
 0x11f   : > { %1478 = vmatprep.mubr.f32.mxu0 %v2984_v0  ;;  %v1181_v23 = vpop.f32.mrb[25].mxu1  ;;  %v1187_v2 = vadd.f32 %v2642_v22, %v3203_v63 }
 0x120   : > { %v1182_v55 = vadd.f32 %v3203_v63, %v1181_v23 }
 0x122   : > { %2549 = vmatmul.mubr.msk.f32.gmra.mrb[14].mxu0 %vm551_vm1, %v1147_v24  ;;  %v2645_v26 = vpop.f32.mrb[26].mxu1 }
 0x123   : > { %1484 = vmatprep.mubr.f32.mxu0 %v2984_v0  ;;  %v1197_v27 = vadd.f32 %v2645_v26, %v3203_v63  ;;  %v1191_v28 = vpop.f32.mrb[27].mxu1 }
 0x124   : > { %v1192_v29 = vadd.f32 %v3203_v63, %v1191_v28 }
 0x126   : > { %2550 = vmatmul.mubr.msk.f32.gmra.mrb[16].mxu0 %vm551_vm1, %v1152_v25  ;;  %v2648_v30 = vpop.f32.mrb[28].mxu1 }
 0x127   : > { %1490 = vmatprep.mubr.f32.mxu0 %v2984_v0  ;;  %v1207_v31 = vadd.f32 %v2648_v30, %v3203_v63  ;;  %v1201_v32 = vpop.f32.mrb[29].mxu1 }
 0x128   : > { %v1202_v34 = vadd.f32 %v3203_v63, %v1201_v32 }
 0x12a   : > { %2551 = vmatmul.mubr.msk.f32.gmra.mrb[18].mxu0 %vm551_vm1, %v1157_v33  ;;  %v2651_v36 = vpop.f32.mrb[30].mxu1 }
 0x12b   : > { %1496 = vmatprep.mubr.f32.mxu0 %v2984_v0  ;;  %v1217_v37 = vadd.f32 %v2651_v36, %v3203_v63  ;;  %v1211_v38 = vpop.f32.mrb[31].mxu1 }
 0x12c   : > { %v1212_v39 = vadd.f32 %v3203_v63, %v1211_v38 }
 0x12e   : > { %2552 = vmatmul.mubr.msk.f32.gmra.mrb[20].mxu0 %vm551_vm1, %v1162_v35  ;;  %v2654_v40 = vpop.f32.mrb[32].mxu1 }
 0x12f   : > { %1502 = vmatprep.mubr.f32.mxu0 %v2984_v0  ;;  %v1227_v41 = vadd.f32 %v2654_v40, %v3203_v63  ;;  %v1221_v42 = vpop.f32.mrb[33].mxu1 }
 0x130   : > { %v1222_v44 = vadd.f32 %v3203_v63, %v1221_v42 }
 0x132   : > { %2553 = vmatmul.mubr.msk.f32.gmra.mrb[22].mxu0 %vm551_vm1, %v1167_v43  ;;  %v2657_v46 = vpop.f32.mrb[34].mxu1 }
 0x133   : > { %1508 = vmatprep.mubr.f32.mxu0 %v2984_v0  ;;  %v1237_v47 = vadd.f32 %v2657_v46, %v3203_v63  ;;  %v1231_v48 = vpop.f32.mrb[35].mxu1 }
 0x134   : > { %v1232_v49 = vadd.f32 %v3203_v63, %v1231_v48 }
 0x136   : > { %2554 = vmatmul.mubr.msk.f32.gmra.mrb[24].mxu0 %vm551_vm1, %v1172_v45  ;;  %v2660_v51 = vpop.f32.mrb[36].mxu1 }
 0x137   : > { %1514 = vmatprep.mubr.f32.mxu0 %v2984_v0  ;;  %v1247_v52 = vadd.f32 %v2660_v51, %v3203_v63  ;;  %v1241_v53 = vpop.f32.mrb[37].mxu1 }
 0x138   : > { %v1242_v54 = vadd.f32 %v3203_v63, %v1241_v53 }
 0x13a   : > { %2555 = vmatmul.mubr.msk.f32.gmra.mrb[26].mxu0 %vm551_vm1, %v1177_v50  ;;  %v2663_v56 = vpop.f32.mrb[38].mxu1 }
 0x13b   : > { %1520 = vmatprep.mubr.f32.mxu0 %v2984_v0  ;;  %v1257_v57 = vadd.f32 %v2663_v56, %v3203_v63  ;;  %v1251_v60 = vpop.f32.mrb[39].mxu1 }
 0x13c   : > { %v1252_v1 = vadd.f32 %v3203_v63, %v1251_v60 }
 0x13e   : > { %2556 = vmatmul.mubr.msk.f32.gmra.mrb[28].mxu0 %vm551_vm1, %v1182_v55  ;;  %v2666_v3 = vpop.f32.mrb[40].mxu1 }
 0x13f   : > { %1526 = vmatprep.mubr.f32.mxu0 %v2984_v0  ;;  %v1267_v4 = vadd.f32 %v2666_v3, %v3203_v63  ;;  %v1261_v5 = vpop.f32.mrb[41].mxu1 }
 0x140   : > { %v1262_v6 = vadd.f32 %v3203_v63, %v1261_v5 }
 0x142   : > { %2557 = vmatmul.mubr.msk.f32.gmra.mrb[30].mxu0 %vm551_vm1, %v1187_v2 }
 0x143   : > { %1532 = vmatprep.mubr.f32.mxu0 %v2984_v0 }
 0x146   : > { %2558 = vmatmul.mubr.msk.f32.gmra.mrb[32].mxu0 %vm551_vm1, %v1192_v29 }
 0x147   : > { %1538 = vmatprep.mubr.f32.mxu0 %v2984_v0 }
 0x14a   : > { %2559 = vmatmul.mubr.msk.f32.gmra.mrb[34].mxu0 %vm551_vm1, %v1197_v27 }
 0x14b   : > { %1544 = vmatprep.mubr.f32.mxu0 %v2984_v0 }
 0x14e   : > { %2560 = vmatmul.mubr.msk.f32.gmra.mrb[36].mxu0 %vm551_vm1, %v1202_v34 }
 0x14f   : > { %1550 = vmatprep.mubr.f32.mxu0 %v2984_v0 }
 0x152   : > { %2561 = vmatmul.mubr.msk.f32.gmra.mrb[38].mxu0 %vm551_vm1, %v1207_v31 }
 0x153   : > { %1556 = vmatprep.mubr.f32.mxu0 %v2984_v0 }
 0x156   : > { %2562 = vmatmul.mubr.msk.f32.gmra.mrb[40].mxu0 %vm551_vm1, %v1212_v39 }
 0x157   : > { %1562 = vmatprep.mubr.f32.mxu0 %v2984_v0 }
 0x15a   : > { %2563 = vmatmul.mubr.msk.f32.gmra.mrb[42].mxu0 %vm551_vm1, %v1217_v37 }
 0x15b   : > { %1568 = vmatprep.mubr.f32.mxu0 %v2984_v0 }
 0x15e   : > { %2564 = vmatmul.mubr.msk.f32.gmra.mrb[44].mxu0 %vm551_vm1, %v1222_v44 }
 0x15f   : > { %1574 = vmatprep.mubr.f32.mxu0 %v2984_v0 }
 0x162   : > { %2565 = vmatmul.mubr.msk.f32.gmra.mrb[46].mxu0 %vm551_vm1, %v1227_v41 }
 0x163   : > { %1580 = vmatprep.mubr.f32.mxu0 %v2984_v0 }
 0x166   : > { %2566 = vmatmul.mubr.msk.f32.gmra.mrb[48].mxu0 %vm551_vm1, %v1232_v49 }
 0x167   : > { %1586 = vmatprep.mubr.f32.mxu0 %v2984_v0 }
 0x16a   : > { %2567 = vmatmul.mubr.msk.f32.gmra.mrb[50].mxu0 %vm551_vm1, %v1237_v47 }
 0x16b   : > { %1592 = vmatprep.mubr.f32.mxu0 %v2984_v0 }
 0x16e   : > { %2568 = vmatmul.mubr.msk.f32.gmra.mrb[52].mxu0 %vm551_vm1, %v1242_v54 }
 0x16f   : > { %1598 = vmatprep.mubr.f32.mxu0 %v2984_v0 }
 0x172   : > { %2569 = vmatmul.mubr.msk.f32.gmra.mrb[54].mxu0 %vm551_vm1, %v1247_v52 }
 0x173   : > { %1604 = vmatprep.mubr.f32.mxu0 %v2984_v0 }
 0x176   : > { %2570 = vmatmul.mubr.msk.f32.gmra.mrb[56].mxu0 %vm551_vm1, %v1252_v1 }
 0x177   : > { %1610 = vmatprep.mubr.f32.mxu0 %v2984_v0 }
 0x17a   : > { %2571 = vmatmul.mubr.msk.f32.gmra.mrb[58].mxu0 %vm551_vm1, %v1257_v57 }
 0x17b   : > { %1616 = vmatprep.mubr.f32.mxu0 %v2984_v0 }
 0x17e   : > { %2572 = vmatmul.mubr.msk.f32.gmra.mrb[60].mxu0 %vm551_vm1, %v1262_v6 }
 0x17f   : > { %1622 = vmatprep.mubr.f32.mxu0 %v2984_v0 }
 0x182   : > { %2573 = vmatmul.mubr.msk.f32.gmra.mrb[62].mxu0 %vm551_vm1, %v1267_v4 }
 0x1ce   : > { %v3300_v63 = vpop.f32.mrb[42].mxu1 }
 0x1cf   : > { %v2177_v7 = vpop.f32.mrb[43].mxu1 }
 0x1d9   : > { %v3302_v8 = vpop.f32.mrb[0].mxu0 }
 0x1da   : > { %v3304_v9 = vpop.f32.mrb[1].mxu0 }
 0x1db   : > { %v1629_v10 = vmax.f32 %v3302_v8, %v3304_v9 }
 0x1dd   : > { %1630 = vmax.xlane.f32.xlu1 %v1629_v10  ;;  %v3308_v11 = vpop.f32.mrb[2].mxu0 }
 0x1de   : > { %v3310_v12 = vpop.f32.mrb[3].mxu0 }
 0x1df   : > { %v1632_v0 = vmax.f32 %v3308_v11, %v3310_v12 }
 0x1e1   : > { %1633 = vmax.xlane.f32.xlu1 %v1632_v0  ;;  %v3314_v13 = vpop.f32.mrb[4].mxu0 }
 0x1e2   : > { %v3316_v14 = vpop.f32.mrb[5].mxu0 }
 0x1e3   : > { %v1635_v15 = vmax.f32 %v3314_v13, %v3316_v14 }
 0x1e5   : > { %1636 = vmax.xlane.f32.xlu0 %v1635_v15  ;;  %v3320_v16 = vpop.f32.mrb[6].mxu0 }
 0x1e6   : > { %v3322_v17 = vpop.f32.mrb[7].mxu0 }
 0x1e7   : > { %v1638_v18 = vmax.f32 %v3320_v16, %v3322_v17 }
 0x1e9   : > { %1639 = vmax.xlane.f32.xlu1 %v1638_v18  ;;  %v3326_v19 = vpop.f32.mrb[8].mxu0 }
 0x1ea   : > { %v3328_v20 = vpop.f32.mrb[9].mxu0 }
 0x1eb   : > { %v1641_v21 = vmax.f32 %v3326_v19, %v3328_v20 }
 0x1ed   : > { %1642 = vmax.xlane.f32.xlu1 %v1641_v21  ;;  %v3332_v22 = vpop.f32.mrb[10].mxu0 }
 0x1ee   : > { %v3334_v23 = vpop.f32.mrb[11].mxu0 }
 0x1ef   : > { %v1644_v24 = vmax.f32 %v3332_v22, %v3334_v23 }
 0x1f1   : > { %1645 = vmax.xlane.f32.xlu1 %v1644_v24  ;;  %v3338_v25 = vpop.f32.mrb[12].mxu0 }
 0x1f2   : > { %v3340_v26 = vpop.f32.mrb[13].mxu0 }
 0x1f3   : > { %v1647_v27 = vmax.f32 %v3338_v25, %v3340_v26 }
 0x1f5   : > { %1648 = vmax.xlane.f32.xlu1 %v1647_v27  ;;  %v3344_v28 = vpop.f32.mrb[14].mxu0 }
 0x1f6   : > { %v3346_v29 = vpop.f32.mrb[15].mxu0 }
 0x1f7   : > { %v1650_v30 = vmax.f32 %v3344_v28, %v3346_v29 }
 0x1f9   : > { %1651 = vmax.xlane.f32.xlu1 %v1650_v30  ;;  %v3350_v31 = vpop.f32.mrb[16].mxu0 }
 0x1fa   : > { %v3352_v32 = vpop.f32.mrb[17].mxu0 }
 0x1fb   : > { %v1653_v33 = vmax.f32 %v3350_v31, %v3352_v32 }
 0x1fd   : > { %1654 = vmax.xlane.f32.xlu1 %v1653_v33  ;;  %v3356_v34 = vpop.f32.mrb[18].mxu0 }
 0x1fe   : > { %v3358_v35 = vpop.f32.mrb[19].mxu0 }
 0x1ff   : > { %v1656_v36 = vmax.f32 %v3356_v34, %v3358_v35 }
 0x201   : > { %1657 = vmax.xlane.f32.xlu1 %v1656_v36  ;;  %v3362_v37 = vpop.f32.mrb[20].mxu0 }
 0x202   : > { %v3364_v38 = vpop.f32.mrb[21].mxu0 }
 0x203   : > { %v1659_v39 = vmax.f32 %v3362_v37, %v3364_v38 }
 0x205   : > { %1660 = vmax.xlane.f32.xlu1 %v1659_v39  ;;  %v3368_v40 = vpop.f32.mrb[22].mxu0 }
 0x206   : > { %v3370_v41 = vpop.f32.mrb[23].mxu0 }
 0x207   : > { %v1662_v42 = vmax.f32 %v3368_v40, %v3370_v41 }
 0x209   : > { %1663 = vmax.xlane.f32.xlu0 %v1662_v42  ;;  %v3374_v43 = vpop.f32.mrb[24].mxu0 }
 0x20a   : > { %v3376_v44 = vpop.f32.mrb[25].mxu0 }
 0x20b   : > { %v1665_v45 = vmax.f32 %v3374_v43, %v3376_v44 }
 0x20d   : > { %1666 = vmax.xlane.f32.xlu1 %v1665_v45  ;;  %v3380_v46 = vpop.f32.mrb[26].mxu0 }
 0x20e   : > { %v3382_v47 = vpop.f32.mrb[27].mxu0 }
 0x20f   : > { %v1668_v48 = vmax.f32 %v3380_v46, %v3382_v47 }
 0x211   : > { %1669 = vmax.xlane.f32.xlu0 %v1668_v48  ;;  %v3386_v49 = vpop.f32.mrb[28].mxu0 }
 0x212   : > { %v3388_v50 = vpop.f32.mrb[29].mxu0 }
 0x213   : > { %v1671_v51 = vmax.f32 %v3386_v49, %v3388_v50 }
 0x215   : > { %1672 = vmax.xlane.f32.xlu1 %v1671_v51  ;;  %v3392_v52 = vpop.f32.mrb[30].mxu0 }
 0x216   : > { %v3394_v53 = vpop.f32.mrb[31].mxu0 }
 0x217   : > { %v1674_v54 = vmax.f32 %v3392_v52, %v3394_v53 }
 0x219   : > { %1675 = vmax.xlane.f32.xlu0 %v1674_v54  ;;  %v3398_v55 = vpop.f32.mrb[32].mxu0 }
 0x21a   : > { %v3400_v56 = vpop.f32.mrb[33].mxu0 }
 0x21b   : > { %v1677_v57 = vmax.f32 %v3398_v55, %v3400_v56 }
 0x21d   : > { %1678 = vmax.xlane.f32.xlu1 %v1677_v57  ;;  %v3404_v60 = vpop.f32.mrb[34].mxu0 }
 0x21e   : > { %3914 = vst [vmem:[#allocation6_spill] sm:$0xff] %v3404_v60  ;;  %v3406_v1 = vpop.f32.mrb[35].mxu0 }
 0x21f   : > { %3915 = vst [vmem:[#allocation7_spill] sm:$0xff] %v3406_v1  ;;  %v1680_v2 = vmax.f32 %v3404_v60, %v3406_v1 }
 0x221   : > { %1681 = vmax.xlane.f32.xlu0 %v1680_v2  ;;  %v3410_v3 = vpop.f32.mrb[36].mxu0 }
 0x222   : > { %3916 = vst [vmem:[#allocation8_spill] sm:$0xff] %v3410_v3  ;;  %v3412_v4 = vpop.f32.mrb[37].mxu0 }
 0x223   : > { %3917 = vst [vmem:[#allocation9_spill] sm:$0xff] %v3412_v4  ;;  %v1683_v5 = vmax.f32 %v3410_v3, %v3412_v4 }
 0x225   : > { %1684 = vmax.xlane.f32.xlu1 %v1683_v5  ;;  %v3416_v6 = vpop.f32.mrb[38].mxu0 }
 0x226   : > { %3918 = vst [vmem:[#allocation10_spill] sm:$0xff] %v3416_v6  ;;  %v3418_v7 = vpop.f32.mrb[39].mxu0 }
 0x227   : > { %3919 = vst [vmem:[#allocation11_spill] sm:$0xff] %v3418_v7  ;;  %v1686_v10 = vmax.f32 %v3416_v6, %v3418_v7 }
 0x229   : > { %1687 = vmax.xlane.f32.xlu0 %v1686_v10  ;;  %v3422_v0 = vpop.f32.mrb[40].mxu0 }
 0x22a   : > { %3920 = vst [vmem:[#allocation12_spill] sm:$0xff] %v3422_v0  ;;  %v3424_v15 = vpop.f32.mrb[41].mxu0 }
 0x22b   : > { %3921 = vst [vmem:[#allocation13_spill] sm:$0xff] %v3424_v15  ;;  %v1689_v18 = vmax.f32 %v3422_v0, %v3424_v15 }
 0x22d   : > { %1690 = vmax.xlane.f32.xlu1 %v1689_v18  ;;  %v3428_v21 = vpop.f32.mrb[42].mxu0 }
 0x22e   : > { %3922 = vst [vmem:[#allocation14_spill] sm:$0xff] %v3428_v21  ;;  %v3430_v24 = vpop.f32.mrb[43].mxu0 }
 0x22f   : > { %3923 = vst [vmem:[#allocation15_spill] sm:$0xff] %v3430_v24  ;;  %v1692_v27 = vmax.f32 %v3428_v21, %v3430_v24 }
 0x231   : > { %1693 = vmax.xlane.f32.xlu0 %v1692_v27  ;;  %v3434_v30 = vpop.f32.mrb[44].mxu0 }
 0x232   : > { %3924 = vst [vmem:[#allocation16_spill] sm:$0xff] %v3434_v30  ;;  %v3436_v33 = vpop.f32.mrb[45].mxu0 }
 0x233   : > { %3925 = vst [vmem:[#allocation17_spill] sm:$0xff] %v3436_v33  ;;  %v1695_v36 = vmax.f32 %v3434_v30, %v3436_v33 }
 0x235   : > { %1696 = vmax.xlane.f32.xlu1 %v1695_v36  ;;  %v3440_v39 = vpop.f32.mrb[46].mxu0 }
 0x236   : > { %3926 = vst [vmem:[#allocation18_spill] sm:$0xff] %v3440_v39  ;;  %v3442_v42 = vpop.f32.mrb[47].mxu0 }
 0x237   : > { %3927 = vst [vmem:[#allocation19_spill] sm:$0xff] %v3442_v42  ;;  %v1698_v45 = vmax.f32 %v3440_v39, %v3442_v42 }
 0x239   : > { %1699 = vmax.xlane.f32.xlu0 %v1698_v45  ;;  %v3446_v48 = vpop.f32.mrb[48].mxu0 }
 0x23a   : > { %v3448_v51 = vpop.f32.mrb[49].mxu0 }
 0x23d   : > { %v3452_v57 = vpop.f32.mrb[50].mxu0 }
 0x23e   : > { %v3454_v2 = vpop.f32.mrb[51].mxu0 }
 0x241   : > { %v3458_v10 = vpop.f32.mrb[52].mxu0 }
 0x242   : > { %v3460_v18 = vpop.f32.mrb[53].mxu0 }
 0x245   : > { %v3464_v36 = vpop.f32.mrb[54].mxu0 }
 0x246   : > { %v3466_v45 = vpop.f32.mrb[55].mxu0 }
 0x249   : > { %v3470_v58 = vpop.f32.mrb[56].mxu0 }
 0x24a   : > { %v3472_v62 = vpop.f32.mrb[57].mxu0 }
 0x24d   : > { %v3476_v61 = vpop.f32.mrb[58].mxu0 }
 0x24e   : > { %v3478_v59 = vpop.f32.mrb[59].mxu0 }
 0x251   : > { %v3482_v42 = vpop.f32.mrb[60].mxu0 }
 0x252   : > { %v3484_v39 = vpop.f32.mrb[61].mxu0 }
 0x255   : > { %v3488_v33 = vpop.f32.mrb[62].mxu0 }
 0x256   : > { %v3490_v30 = vpop.f32.mrb[63].mxu0 }
 0x26a   : > { %v1631_v24 = vpop.xlane.xlu1 %1630 }
 0x26b   : > { %v1725_v21 = vsub.f32 %v3302_v8, %v1631_v24  ;;  %v1726_v15 = vsub.f32 %v3304_v9, %v1631_v24 }
 0x26d   : > { %v1789_v27 = vmul.f32 1.442695, %v1725_v21  ;;  %v1791_v0 = vmul.f32 1.442695, %v1726_v15 }
 0x26e   : > { %v1634_v7 = vpop.xlane.xlu1 %1633 }
 0x26f   : > { %2764 = vpow2.f32 %v1789_v27  ;;  %v1727_v6 = vsub.f32 %v3308_v11, %v1634_v7  ;;  %v1728_v54 = vsub.f32 %v3310_v12, %v1634_v7 }
 0x270   : > { %2766 = vpow2.f32 %v1791_v0 }
 0x271   : > { %v1793_v4 = vmul.f32 1.442695, %v1727_v6  ;;  %v1795_v3 = vmul.f32 1.442695, %v1728_v54 }
 0x272   : > { %v1637_v1 = vpop.xlane.xlu0 %1636 }
 0x273   : > { %2768 = vpow2.f32 %v1793_v4  ;;  %v1729_v5 = vsub.f32 %v3314_v13, %v1637_v1  ;;  %v1730_v60 = vsub.f32 %v3316_v14, %v1637_v1 }
 0x274   : > { %2770 = vpow2.f32 %v1795_v3 }
 0x275   : > { %v1797_v8 = vmul.f32 1.442695, %v1729_v5  ;;  %v1799_v9 = vmul.f32 1.442695, %v1730_v60 }
 0x276   : > { %v1640_v21 = vpop.xlane.xlu1 %1639 }
 0x277   : > { %2772 = vpow2.f32 %v1797_v8  ;;  %v1731_v15 = vsub.f32 %v3320_v16, %v1640_v21  ;;  %v1732_v11 = vsub.f32 %v3322_v17, %v1640_v21 }
 0x278   : > { %2774 = vpow2.f32 %v1799_v9  ;;  %v3928_v9 = vmax.f32 %v3446_v48, %v3448_v51 }
 0x279   : > { %v3502_v12 = vpop.eup %2764  ;;  %v1801_v6 = vmul.f32 1.442695, %v1731_v15  ;;  %v1803_v7 = vmul.f32 1.442695, %v1732_v11 }
 0x27a   : > { %v3504_v0 = vpop.eup %2766  ;;  %v1643_v4 = vpop.xlane.xlu1 %1642 }
 0x27b   : > { %2776 = vpow2.f32 %v1801_v6  ;;  %v1733_v13 = vsub.f32 %v3326_v19, %v1643_v4  ;;  %v1734_v14 = vsub.f32 %v3328_v20, %v1643_v4  ;;  %v1917_v60 = vadd.f32 %v3504_v0, %v3502_v12 }
 0x27c   : > { %2778 = vpow2.f32 %v1803_v7 }
 0x27d   : > { %v3510_v16 = vpop.eup %2768  ;;  %v1805_v17 = vmul.f32 1.442695, %v1733_v13  ;;  %v1807_v1 = vmul.f32 1.442695, %v1734_v14  ;;  %1918 = vadd.xlane.f32.xlu1 %v1917_v60  ;;  %v3929_v13 = vmax.f32 %v3452_v57, %v3454_v2 }
 0x27e   : > { %v3512_v3 = vpop.eup %2770  ;;  %v1646_v24 = vpop.xlane.xlu1 %1645 }
 0x27f   : > { %2780 = vpow2.f32 %v1805_v17  ;;  %v1735_v54 = vsub.f32 %v3332_v22, %v1646_v24  ;;  %v1736_v5 = vsub.f32 %v3334_v23, %v1646_v24  ;;  %v1920_v19 = vadd.f32 %v3512_v3, %v3510_v16 }
 0x280   : > { %2782 = vpow2.f32 %v1807_v1 }
 0x281   : > { %v3518_v20 = vpop.eup %2772  ;;  %v1809_v27 = vmul.f32 1.442695, %v1735_v54  ;;  %v1811_v8 = vmul.f32 1.442695, %v1736_v5  ;;  %1921 = vadd.xlane.f32.xlu0 %v1920_v19  ;;  %1702 = vmax.xlane.f32.xlu1 %v3928_v9  ;;  %v3930_v5 = vmax.f32 %v3458_v10, %v3460_v18 }
 0x282   : > { %v3523_v21 = vpop.eup %2774  ;;  %v1649_v15 = vpop.xlane.xlu1 %1648 }
 0x283   : > { %2784 = vpow2.f32 %v1809_v27  ;;  %v1737_v22 = vsub.f32 %v3338_v25, %v1649_v15  ;;  %v1738_v23 = vsub.f32 %v3340_v26, %v1649_v15  ;;  %v1923_v11 = vadd.f32 %v3523_v21, %v3518_v20 }
 0x284   : > { %2786 = vpow2.f32 %v1811_v8 }
 0x285   : > { %v3529_v6 = vpop.eup %2776  ;;  %v1813_v7 = vmul.f32 1.442695, %v1737_v22  ;;  %v1815_v4 = vmul.f32 1.442695, %v1738_v23  ;;  %1924 = vadd.xlane.f32.xlu1 %v1923_v11  ;;  %1705 = vmax.xlane.f32.xlu0 %v3929_v13  ;;  %v3931_v23 = vmax.f32 %v3464_v36, %v3466_v45 }
 0x286   : > { %v3534_v14 = vpop.eup %2778  ;;  %v1652_v60 = vpop.xlane.xlu1 %1651 }
 0x287   : > { %2788 = vpow2.f32 %v1813_v7  ;;  %v1739_v25 = vsub.f32 %v3344_v28, %v1652_v60  ;;  %v1740_v26 = vsub.f32 %v3346_v29, %v1652_v60  ;;  %v1926_v17 = vadd.f32 %v3534_v14, %v3529_v6 }
 0x288   : > { %2790 = vpow2.f32 %v1815_v4 }
 0x289   : > { %v3540_v1 = vpop.eup %2780  ;;  %v1817_v24 = vmul.f32 1.442695, %v1739_v25  ;;  %v1819_v54 = vmul.f32 1.442695, %v1740_v26  ;;  %1927 = vadd.xlane.f32.xlu0 %v1926_v17  ;;  %1708 = vmax.xlane.f32.xlu1 %v3930_v5  ;;  %v3932_v26 = vmax.f32 %v3470_v58, %v3472_v62 }
 0x28a   : > { %v3545_v19 = vpop.eup %2782  ;;  %v1655_v27 = vpop.xlane.xlu1 %1654 }
 0x28b   : > { %2792 = vpow2.f32 %v1817_v24  ;;  %v1741_v28 = vsub.f32 %v3350_v31, %v1655_v27  ;;  %v1742_v29 = vsub.f32 %v3352_v32, %v1655_v27  ;;  %v1929_v8 = vadd.f32 %v3545_v19, %v3540_v1 }
 0x28c   : > { %2794 = vpow2.f32 %v1819_v54 }
 0x28d   : > { %v3551_v9 = vpop.eup %2784  ;;  %v1821_v15 = vmul.f32 1.442695, %v1741_v28  ;;  %v1823_v22 = vmul.f32 1.442695, %v1742_v29  ;;  %1930 = vadd.xlane.f32.xlu1 %v1929_v8  ;;  %1711 = vmax.xlane.f32.xlu0 %v3931_v23  ;;  %v3933_v29 = vmax.f32 %v3476_v61, %v3478_v59 }
 0x28e   : > { %v3556_v11 = vpop.eup %2786  ;;  %v1658_v7 = vpop.xlane.xlu1 %1657 }
 0x28f   : > { %2796 = vpow2.f32 %v1821_v15  ;;  %v1743_v31 = vsub.f32 %v3356_v34, %v1658_v7  ;;  %v1744_v32 = vsub.f32 %v3358_v35, %v1658_v7  ;;  %v1932_v4 = vadd.f32 %v3556_v11, %v3551_v9 }
 0x290   : > { %2798 = vpow2.f32 %v1823_v22 }
 0x291   : > { %v3562_v13 = vpop.eup %2788  ;;  %v1825_v60 = vmul.f32 1.442695, %v1743_v31  ;;  %v1827_v25 = vmul.f32 1.442695, %v1744_v32  ;;  %1933 = vadd.xlane.f32.xlu0 %v1932_v4  ;;  %1714 = vmax.xlane.f32.xlu1 %v3932_v26  ;;  %v3934_v32 = vmax.f32 %v3482_v42, %v3484_v39 }
 0x292   : > { %v3567_v17 = vpop.eup %2790  ;;  %v1661_v24 = vpop.xlane.xlu1 %1660 }
 0x293   : > { %2800 = vpow2.f32 %v1825_v60  ;;  %v1745_v34 = vsub.f32 %v3362_v37, %v1661_v24  ;;  %v1746_v35 = vsub.f32 %v3364_v38, %v1661_v24  ;;  %v1935_v54 = vadd.f32 %v3567_v17, %v3562_v13 }
 0x294   : > { %2802 = vpow2.f32 %v1827_v25 }
 0x295   : > { %v3573_v5 = vpop.eup %2792  ;;  %v1829_v27 = vmul.f32 1.442695, %v1745_v34  ;;  %v1831_v28 = vmul.f32 1.442695, %v1746_v35  ;;  %1936 = vadd.xlane.f32.xlu1 %v1935_v54  ;;  %1717 = vmax.xlane.f32.xlu0 %v3933_v29  ;;  %v3935_v35 = vmax.f32 %v3488_v33, %v3490_v30 }
 0x296   : > { %v3578_v8 = vpop.eup %2794  ;;  %v1664_v15 = vpop.xlane.xlu0 %1663 }
 0x297   : > { %2804 = vpow2.f32 %v1829_v27  ;;  %v1747_v37 = vsub.f32 %v3368_v40, %v1664_v15  ;;  %v1748_v38 = vsub.f32 %v3370_v41, %v1664_v15  ;;  %v1938_v22 = vadd.f32 %v3578_v8, %v3573_v5 }
 0x298   : > { %2806 = vpow2.f32 %v1831_v28 }
 0x299   : > { %v3584_v23 = vpop.eup %2796  ;;  %v1833_v7 = vmul.f32 1.442695, %v1747_v37  ;;  %v1835_v31 = vmul.f32 1.442695, %v1748_v38  ;;  %1939 = vadd.xlane.f32.xlu0 %v1938_v22  ;;  %1720 = vmax.xlane.f32.xlu1 %v3934_v32 }
 0x29a   : > { %v3589_v4 = vpop.eup %2798  ;;  %v1667_v60 = vpop.xlane.xlu1 %1666 }
 0x29b   : > { %2808 = vpow2.f32 %v1833_v7  ;;  %v1749_v40 = vsub.f32 %v3374_v43, %v1667_v60  ;;  %v1750_v41 = vsub.f32 %v3376_v44, %v1667_v60  ;;  %v1941_v25 = vadd.f32 %v3589_v4, %v3584_v23 }
 0x29c   : > { %2810 = vpow2.f32 %v1835_v31 }
 0x29d   : > { %v3595_v26 = vpop.eup %2800  ;;  %v1837_v24 = vmul.f32 1.442695, %v1749_v40  ;;  %v1839_v34 = vmul.f32 1.442695, %v1750_v41  ;;  %1942 = vadd.xlane.f32.xlu1 %v1941_v25  ;;  %1723 = vmax.xlane.f32.xlu0 %v3935_v35 }
 0x29e   : > { %v3600_v54 = vpop.eup %2802  ;;  %v1670_v27 = vpop.xlane.xlu0 %1669 }
 0x29f   : > { %2812 = vpow2.f32 %v1837_v24  ;;  %v1751_v43 = vsub.f32 %v3380_v46, %v1670_v27  ;;  %v1752_v44 = vsub.f32 %v3382_v47, %v1670_v27  ;;  %v1944_v28 = vadd.f32 %v3600_v54, %v3595_v26 }
 0x2a0   : > { %2814 = vpow2.f32 %v1839_v34  ;;  %v2180_v24 = vsel %vm2179_vm2, %v3300_v63, -inf }
 0x2a1   : > { %v3606_v29 = vpop.eup %2804  ;;  %v1841_v15 = vmul.f32 1.442695, %v1751_v43  ;;  %v1843_v37 = vmul.f32 1.442695, %v1752_v44  ;;  %1945 = vadd.xlane.f32.xlu0 %v1944_v28 }
 0x2a2   : > { %v3608_v38 = vpop.eup %2806  ;;  %v1673_v22 = vpop.xlane.xlu1 %1672 }
 0x2a3   : > { %2816 = vpow2.f32 %v1841_v15  ;;  %v1753_v7 = vsub.f32 %v3386_v49, %v1673_v22  ;;  %v1754_v31 = vsub.f32 %v3388_v50, %v1673_v22  ;;  %v1947_v46 = vadd.f32 %v3608_v38, %v3606_v29 }
 0x2a4   : > { %2818 = vpow2.f32 %v1843_v37 }
 0x2a5   : > { %v3614_v47 = vpop.eup %2808  ;;  %v1845_v32 = vmul.f32 1.442695, %v1753_v7  ;;  %v1847_v60 = vmul.f32 1.442695, %v1754_v31  ;;  %1948 = vadd.xlane.f32.xlu1 %v1947_v46  ;;  %v3936_v46 = vld [vmem:[#allocation6_spill] sm:$0xff] }
 0x2a6   : > { %v3616_v40 = vpop.eup %2810  ;;  %v1676_v41 = vpop.xlane.xlu0 %1675 }
 0x2a7   : > { %2820 = vpow2.f32 %v1845_v32  ;;  %v1755_v25 = vsub.f32 %v3392_v52, %v1676_v41  ;;  %v1756_v49 = vsub.f32 %v3394_v53, %v1676_v41  ;;  %v1950_v50 = vadd.f32 %v3616_v40, %v3614_v47 }
 0x2a8   : > { %2822 = vpow2.f32 %v1847_v60  ;;  %v3937_v60 = vld [vmem:[#allocation7_spill] sm:$0xff] }
 0x2a9   : > { %v3624_v34 = vpop.eup %2812  ;;  %v1849_v35 = vmul.f32 1.442695, %v1755_v25  ;;  %v1851_v27 = vmul.f32 1.442695, %v1756_v49  ;;  %2181 = vmax.xlane.f32.xlu1 %v2180_v24  ;;  %1951 = vadd.xlane.f32.xlu0 %v1950_v50 }
 0x2aa   : > { %v3626_v43 = vpop.eup %2814  ;;  %v1679_v44 = vpop.xlane.xlu1 %1678 }
 0x2ab   : > { %2824 = vpow2.f32 %v1849_v35  ;;  %v1757_v52 = vsub.f32 %v3398_v55, %v1679_v44  ;;  %v1758_v53 = vsub.f32 %v3400_v56, %v1679_v44  ;;  %v1953_v28 = vadd.f32 %v3626_v43, %v3624_v34  ;;  %v3939_v35 = vld [vmem:[#allocation8_spill] sm:$0xff]  ;;  %v3940_v44 = vld [vmem:[#allocation9_spill] sm:$0xff] }
 0x2ac   : > { %2826 = vpow2.f32 %v1851_v27 }
 0x2ad   : > { %v3632_v15 = vpop.eup %2816  ;;  %v1853_v37 = vmul.f32 1.442695, %v1757_v52  ;;  %v1855_v22 = vmul.f32 1.442695, %v1758_v53  ;;  %1954 = vadd.xlane.f32.xlu0 %v1953_v28 }
 0x2ae   : > { %v3634_v7 = vpop.eup %2818  ;;  %v1682_v31 = vpop.xlane.xlu0 %1681 }
 0x2af   : > { %2828 = vpow2.f32 %v1853_v37  ;;  %v1759_v32 = vsub.f32 %v3936_v46, %v1682_v31  ;;  %v1760_v41 = vsub.f32 %v3937_v60, %v1682_v31  ;;  %v1956_v55 = vadd.f32 %v3634_v7, %v3632_v15 }
 0x2b0   : > { %2830 = vpow2.f32 %v1855_v22 }
 0x2b1   : > { %v3640_v56 = vpop.eup %2820  ;;  %v1857_v25 = vmul.f32 1.442695, %v1759_v32  ;;  %v1859_v49 = vmul.f32 1.442695, %v1760_v41  ;;  %1957 = vadd.xlane.f32.xlu1 %v1956_v55  ;;  %v3943_v32 = vld [vmem:[#allocation10_spill] sm:$0xff]  ;;  %v3944_v41 = vld [vmem:[#allocation11_spill] sm:$0xff] }
 0x2b2   : > { %3938 = vst [vmem:[#allocation6_spill] sm:$0xff] %v3640_v56  ;;  %v3642_v50 = vpop.eup %2822  ;;  %v1685_v24 = vpop.xlane.xlu1 %1684 }
 0x2b3   : > { %2832 = vpow2.f32 %v1857_v25  ;;  %v1761_v27 = vsub.f32 %v3939_v35, %v1685_v24  ;;  %v1762_v52 = vsub.f32 %v3940_v44, %v1685_v24  ;;  %v1959_v53 = vadd.f32 %v3642_v50, %v3640_v56 }
 0x2b4   : > { %2834 = vpow2.f32 %v1859_v49 }
 0x2b5   : > { %v3648_v28 = vpop.eup %2824  ;;  %v1861_v37 = vmul.f32 1.442695, %v1761_v27  ;;  %v1863_v22 = vmul.f32 1.442695, %v1762_v52  ;;  %1960 = vadd.xlane.f32.xlu0 %v1959_v53  ;;  %v3947_v52 = vld [vmem:[#allocation12_spill] sm:$0xff] }
 0x2b6   : > { %3941 = vst [vmem:[#allocation7_spill] sm:$0xff] %v3648_v28  ;;  %v3650_v31 = vpop.eup %2826  ;;  %v1688_v46 = vpop.xlane.xlu0 %1687 }
 0x2b7   : > { %3942 = vst [vmem:[#allocation8_spill] sm:$0xff] %v3650_v31  ;;  %2836 = vpow2.f32 %v1861_v37  ;;  %v1763_v60 = vsub.f32 %v3943_v32, %v1688_v46  ;;  %v1764_v55 = vsub.f32 %v3944_v41, %v1688_v46  ;;  %v1962_v25 = vadd.f32 %v3650_v31, %v3648_v28  ;;  %v3948_v37 = vld [vmem:[#allocation13_spill] sm:$0xff] }
 0x2b8   : > { %2838 = vpow2.f32 %v1863_v22 }
 0x2b9   : > { %v3656_v24 = vpop.eup %2828  ;;  %v1865_v49 = vmul.f32 1.442695, %v1763_v60  ;;  %v1867_v35 = vmul.f32 1.442695, %v1764_v55  ;;  %1963 = vadd.xlane.f32.xlu1 %v1962_v25  ;;  %v3951_v25 = vld [vmem:[#allocation14_spill] sm:$0xff] }
 0x2ba   : > { %3945 = vst [vmem:[#allocation9_spill] sm:$0xff] %v3656_v24  ;;  %v3658_v27 = vpop.eup %2830  ;;  %v1691_v44 = vpop.xlane.xlu1 %1690 }
 0x2bb   : > { %3946 = vst [vmem:[#allocation10_spill] sm:$0xff] %v3658_v27  ;;  %2840 = vpow2.f32 %v1865_v49  ;;  %v1765_v53 = vsub.f32 %v3947_v52, %v1691_v44  ;;  %v1766_v56 = vsub.f32 %v3948_v37, %v1691_v44  ;;  %v1965_v46 = vadd.f32 %v3658_v27, %v3656_v24  ;;  %v3952_v49 = vld [vmem:[#allocation15_spill] sm:$0xff] }
 0x2bc   : > { %2842 = vpow2.f32 %v1867_v35 }
 0x2bd   : > { %v3664_v32 = vpop.eup %2832  ;;  %v1869_v22 = vmul.f32 1.442695, %v1765_v53  ;;  %v1871_v41 = vmul.f32 1.442695, %v1766_v56  ;;  %1966 = vadd.xlane.f32.xlu0 %v1965_v46  ;;  %v3953_v46 = vld [vmem:[#allocation16_spill] sm:$0xff] }
 0x2be   : > { %3949 = vst [vmem:[#allocation11_spill] sm:$0xff] %v3664_v32  ;;  %v3666_v60 = vpop.eup %2834  ;;  %v1694_v55 = vpop.xlane.xlu0 %1693 }
 0x2bf   : > { %3950 = vst [vmem:[#allocation12_spill] sm:$0xff] %v3666_v60  ;;  %2844 = vpow2.f32 %v1869_v22  ;;  %v1767_v28 = vsub.f32 %v3951_v25, %v1694_v55  ;;  %v1768_v31 = vsub.f32 %v3952_v49, %v1694_v55  ;;  %v1968_v44 = vadd.f32 %v3666_v60, %v3664_v32  ;;  %v3954_v22 = vld [vmem:[#allocation17_spill] sm:$0xff] }
 0x2c0   : > { %2846 = vpow2.f32 %v1871_v41 }
 0x2c1   : > { %v3672_v52 = vpop.eup %2836  ;;  %v1873_v35 = vmul.f32 1.442695, %v1767_v28  ;;  %v1875_v37 = vmul.f32 1.442695, %v1768_v31  ;;  %1969 = vadd.xlane.f32.xlu1 %v1968_v44  ;;  %v3955_v44 = vld [vmem:[#allocation18_spill] sm:$0xff] }
 0x2c2   : > { %v3674_v53 = vpop.eup %2838  ;;  %v1697_v56 = vpop.xlane.xlu1 %1696 }
 0x2c3   : > { %2848 = vpow2.f32 %v1873_v35  ;;  %v1769_v24 = vsub.f32 %v3953_v46, %v1697_v56  ;;  %v1770_v27 = vsub.f32 %v3954_v22, %v1697_v56  ;;  %v1971_v55 = vadd.f32 %v3674_v53, %v3672_v52  ;;  %v3956_v35 = vld [vmem:[#allocation19_spill] sm:$0xff] }
 0x2c4   : > { %2850 = vpow2.f32 %v1875_v37 }
 0x2c5   : > { %v3680_v25 = vpop.eup %2840  ;;  %v1877_v41 = vmul.f32 1.442695, %v1769_v24  ;;  %v1879_v49 = vmul.f32 1.442695, %v1770_v27  ;;  %1972 = vadd.xlane.f32.xlu0 %v1971_v55 }
 0x2c6   : > { %v3682_v28 = vpop.eup %2842  ;;  %v1700_v31 = vpop.xlane.xlu0 %1699 }
 0x2c7   : > { %2852 = vpow2.f32 %v1877_v41  ;;  %v1771_v32 = vsub.f32 %v3955_v44, %v1700_v31  ;;  %v1772_v60 = vsub.f32 %v3956_v35, %v1700_v31  ;;  %v1974_v56 = vadd.f32 %v3682_v28, %v3680_v25 }
 0x2c8   : > { %2854 = vpow2.f32 %v1879_v49 }
 0x2c9   : > { %v3688_v46 = vpop.eup %2844  ;;  %v1881_v37 = vmul.f32 1.442695, %v1771_v32  ;;  %v1883_v22 = vmul.f32 1.442695, %v1772_v60  ;;  %1975 = vadd.xlane.f32.xlu1 %v1974_v56 }
 0x2ca   : > { %3957 = vst [vmem:[#allocation13_spill] sm:$0xff] %v3688_v46  ;;  %v3690_v24 = vpop.eup %2846 }
 0x2cb   : > { %3958 = vst [vmem:[#allocation14_spill] sm:$0xff] %v3690_v24  ;;  %2856 = vpow2.f32 %v1881_v37  ;;  %v1977_v27 = vadd.f32 %v3690_v24, %v3688_v46 }
 0x2cc   : > { %2858 = vpow2.f32 %v1883_v22 }
 0x2cd   : > { %v3694_v55 = vpop.eup %2848  ;;  %1978 = vadd.xlane.f32.xlu0 %v1977_v27 }
 0x2ce   : > { %3959 = vst [vmem:[#allocation15_spill] sm:$0xff] %v3694_v55  ;;  %v3696_v41 = vpop.eup %2850 }
 0x2cf   : > { %3960 = vst [vmem:[#allocation16_spill] sm:$0xff] %v3696_v41  ;;  %v1980_v49 = vadd.f32 %v3696_v41, %v3694_v55 }
 0x2d1   : > { %v3700_v31 = vpop.eup %2852  ;;  %1981 = vadd.xlane.f32.xlu1 %v1980_v49 }
 0x2d2   : > { %3961 = vst [vmem:[#allocation17_spill] sm:$0xff] %v3700_v31  ;;  %v3702_v32 = vpop.eup %2854 }
 0x2d3   : > { %3962 = vst [vmem:[#allocation18_spill] sm:$0xff] %v3702_v32  ;;  %v1983_v60 = vadd.f32 %v3702_v32, %v3700_v31 }
 0x2d5   : > { %v3706_v44 = vpop.eup %2856  ;;  %1984 = vadd.xlane.f32.xlu0 %v1983_v60 }
 0x2d6   : > { %3963 = vst [vmem:[#allocation19_spill] sm:$0xff] %v3706_v44  ;;  %v3708_v35 = vpop.eup %2858 }
 0x2d7   : > { %3964 = vst [vmem:[#allocation20_spill] sm:$0xff] %v3708_v35  ;;  %v1986_v56 = vadd.f32 %v3708_v35, %v3706_v44 }
 0x2d9   : > { %1987 = vadd.xlane.f32.xlu1 %v1986_v56 }
 0x30a   : > { %v1919_v37 = vpop.xlane.xlu1 %1918 }
 0x30b   : > { %2860 = vrcp.f32 %v1919_v37 }
 0x30e   : > { %v1922_v22 = vpop.xlane.xlu0 %1921  ;;  %v1703_v27 = vpop.xlane.xlu1 %1702 }
 0x30f   : > { %2862 = vrcp.f32 %v1922_v22  ;;  %v1773_v49 = vsub.f32 %v3446_v48, %v1703_v27  ;;  %v1774_v46 = vsub.f32 %v3448_v51, %v1703_v27 }
 0x311   : > { %v1885_v55 = vmul.f32 1.442695, %v1773_v49  ;;  %v1887_v31 = vmul.f32 1.442695, %v1774_v46 }
 0x312   : > { %v1925_v32 = vpop.xlane.xlu1 %1924  ;;  %v1706_v41 = vpop.xlane.xlu0 %1705 }
 0x313   : > { %2864 = vpow2.f32 %v1885_v55  ;;  %v1775_v60 = vsub.f32 %v3452_v57, %v1706_v41  ;;  %v1776_v24 = vsub.f32 %v3454_v2, %v1706_v41 }
 0x314   : > { %2866 = vpow2.f32 %v1887_v31 }
 0x315   : > { %2868 = vrcp.f32 %v1925_v32  ;;  %v1889_v56 = vmul.f32 1.442695, %v1775_v60  ;;  %v1891_v37 = vmul.f32 1.442695, %v1776_v24  ;;  %v2861_v22 = vpop.eup %2860 }
 0x316   : > { %v1928_v44 = vpop.xlane.xlu0 %1927  ;;  %v1709_v35 = vpop.xlane.xlu1 %1708  ;;  %v2046_v2 = vmul.f32 %v2861_v22, %v3504_v0  ;;  %v2045_v24 = vmul.f32 %v2861_v22, %v3502_v12 }
 0x317   : > { %2870 = vpow2.f32 %v1889_v56  ;;  %v1777_v48 = vsub.f32 %v3458_v10, %v1709_v35  ;;  %v1778_v51 = vsub.f32 %v3460_v18, %v1709_v35 }
 0x318   : > { %2872 = vpow2.f32 %v1891_v37 }
 0x319   : > { %v2863_v46 = vpop.eup %2862  ;;  %2874 = vrcp.f32 %v1928_v44  ;;  %v1893_v55 = vmul.f32 1.442695, %v1777_v48  ;;  %v1895_v27 = vmul.f32 1.442695, %v1778_v51 }
 0x31a   : > { %v1931_v57 = vpop.xlane.xlu1 %1930  ;;  %v1712_v49 = vpop.xlane.xlu0 %1711  ;;  %v2048_v41 = vmul.f32 %v2863_v46, %v3512_v3  ;;  %v2047_v31 = vmul.f32 %v2863_v46, %v3510_v16 }
 0x31b   : > { %2876 = vpow2.f32 %v1893_v55  ;;  %v1779_v10 = vsub.f32 %v3464_v36, %v1712_v49  ;;  %v1780_v18 = vsub.f32 %v3466_v45, %v1712_v49 }
 0x31c   : > { %2878 = vpow2.f32 %v1895_v27  ;;  %v2667_v32 = vpack.c.bf16 %v2048_v41, %v2046_v2  ;;  %v2669_v44 = vpack.c.bf16 %v2047_v31, %v2045_v24 }
 0x31d   : > { %v3724_v35 = vpop.eup %2864  ;;  %2880 = vrcp.f32 %v1931_v57  ;;  %v1897_v60 = vmul.f32 1.442695, %v1779_v10  ;;  %v1899_v56 = vmul.f32 1.442695, %v1780_v18 }
 0x31e   : > { %v3726_v0 = vpop.eup %2866  ;;  %2668 = vmatprep.subr.bf16.mxu0 %v2667_v32  ;;  %v1934_v3 = vpop.xlane.xlu0 %1933 }
 0x31f   : > { %v1715_v12 = vpop.xlane.xlu1 %1714  ;;  %v2869_v37 = vpop.eup %2868  ;;  %2882 = vpow2.f32 %v1897_v60  ;;  %2670 = vmatpush1.bf16.xpose.msra.mxu0 %v2669_v44  ;;  %v1989_v45 = vadd.f32 %v3726_v0, %v3724_v35 }
 0x320   : > { %v1781_v16 = vsub.f32 %v3470_v58, %v1715_v12  ;;  %v1782_v36 = vsub.f32 %v3472_v62, %v1715_v12  ;;  %2884 = vpow2.f32 %v1899_v56  ;;  %v2050_v57 = vmul.f32 %v2869_v37, %v3523_v21 }
 0x321   : > { %v3732_v22 = vpop.eup %2870  ;;  %2886 = vrcp.f32 %v1934_v3  ;;  %1990 = vadd.xlane.f32.xlu0 %v1989_v45  ;;  %v2049_v24 = vmul.f32 %v2869_v37, %v3518_v20 }
 0x322   : > { %v1901_v48 = vmul.f32 1.442695, %v1781_v16  ;;  %v1903_v51 = vmul.f32 1.442695, %v1782_v36  ;;  %v3734_v46 = vpop.eup %2872  ;;  %v1718_v27 = vpop.xlane.xlu0 %1717 }
 0x323   : > { %v1937_v55 = vpop.xlane.xlu1 %1936  ;;  %v2875_v58 = vpop.eup %2874  ;;  %v1783_v62 = vsub.f32 %v3476_v61, %v1718_v27  ;;  %v1784_v49 = vsub.f32 %v3478_v59, %v1718_v27  ;;  %v1992_v2 = vadd.f32 %v3734_v46, %v3732_v22 }
 0x324   : > { %2888 = vpow2.f32 %v1901_v48  ;;  %v2052_v41 = vmul.f32 %v2875_v58, %v3534_v14  ;;  %v2051_v31 = vmul.f32 %v2875_v58, %v3529_v6 }
 0x325   : > { %2890 = vpow2.f32 %v1903_v51  ;;  %v3744_v10 = vpop.eup %2876  ;;  %v1905_v18 = vmul.f32 1.442695, %v1783_v62  ;;  %v1907_v21 = vmul.f32 1.442695, %v1784_v49  ;;  %1993 = vadd.xlane.f32.xlu1 %v1992_v2 }
 0x326   : > { %v3746_v32 = vpop.eup %2878  ;;  %2892 = vrcp.f32 %v1937_v55  ;;  %v2671_v61 = vpack.c.bf16 %v2052_v41, %v2050_v57  ;;  %v1940_v59 = vpop.xlane.xlu0 %1939  ;;  %v2673_v60 = vpack.c.bf16 %v2051_v31, %v2049_v24 }
 0x327   : > { %v1721_v44 = vpop.xlane.xlu1 %1720  ;;  %v2881_v56 = vpop.eup %2880  ;;  %2894 = vpow2.f32 %v1905_v18  ;;  %v1995_v6 = vadd.f32 %v3746_v32, %v3744_v10 }
 0x328   : > { %v1785_v14 = vsub.f32 %v3482_v42, %v1721_v44  ;;  %v1786_v20 = vsub.f32 %v3484_v39, %v1721_v44  ;;  %2896 = vpow2.f32 %v1907_v21  ;;  %2672 = vmatprep.subr.bf16.mxu0 %v2671_v61  ;;  %v2054_v45 = vmul.f32 %v2881_v56, %v3545_v19 }
 0x329   : > { %v3752_v3 = vpop.eup %2882  ;;  %2898 = vrcp.f32 %v1940_v59  ;;  %2674 = vmatpush1.bf16.xpose.msra.mxu0 %v2673_v60  ;;  %1996 = vadd.xlane.f32.xlu0 %v1995_v6  ;;  %v2053_v57 = vmul.f32 %v2881_v56, %v3540_v1 }
 0x32a   : > { %v1909_v12 = vmul.f32 1.442695, %v1785_v14  ;;  %v1911_v37 = vmul.f32 1.442695, %v1786_v20  ;;  %v3754_v16 = vpop.eup %2884  ;;  %v1724_v36 = vpop.xlane.xlu0 %1723 }
 0x32b   : > { %v2887_v42 = vpop.eup %2886  ;;  %v1943_v39 = vpop.xlane.xlu1 %1942  ;;  %v1787_v48 = vsub.f32 %v3488_v33, %v1724_v36  ;;  %v1788_v51 = vsub.f32 %v3490_v30, %v1724_v36  ;;  %v1998_v55 = vadd.f32 %v3754_v16, %v3752_v3 }
 0x32c   : > { %2900 = vpow2.f32 %v1909_v12  ;;  %v2056_v27 = vmul.f32 %v2887_v42, %v3556_v11  ;;  %v2055_v58 = vmul.f32 %v2887_v42, %v3551_v9 }
 0x32d   : > { %2902 = vpow2.f32 %v1911_v37  ;;  %v1913_v19 = vmul.f32 1.442695, %v1787_v48  ;;  %v1915_v49 = vmul.f32 1.442695, %v1788_v51  ;;  %1999 = vadd.xlane.f32.xlu1 %v1998_v55 }
 0x32e   : > { %v3764_v62 = vpop.eup %2888  ;;  %2904 = vrcp.f32 %v1943_v39  ;;  %v2675_v33 = vpack.c.bf16 %v2056_v27, %v2054_v45  ;;  %v1946_v30 = vpop.xlane.xlu0 %1945  ;;  %v2677_v41 = vpack.c.bf16 %v2055_v58, %v2053_v57 }
 0x32f   : > { %v3766_v2 = vpop.eup %2890  ;;  %2906 = vpow2.f32 %v1913_v19 }
 0x330   : > { %v2001_v24 = vadd.f32 %v3766_v2, %v3764_v62  ;;  %v2893_v11 = vpop.eup %2892  ;;  %2908 = vpow2.f32 %v1915_v49  ;;  %2676 = vmatprep.subr.bf16.mxu0 %v2675_v33 }
 0x331   : > { %v3770_v1 = vpop.eup %2894  ;;  %2910 = vrcp.f32 %v1946_v30  ;;  %2678 = vmatpush1.bf16.xpose.msra.mxu0 %v2677_v41  ;;  %v2058_v61 = vmul.f32 %v2893_v11, %v3567_v17  ;;  %v2057_v44 = vmul.f32 %v2893_v11, %v3562_v13 }
 0x332   : > { %2002 = vadd.xlane.f32.xlu0 %v2001_v24  ;;  %v3772_v9 = vpop.eup %2896  ;;  %v1949_v31 = vpop.xlane.xlu1 %1948 }
 0x333   : > { %v2899_v18 = vpop.eup %2898  ;;  %v2004_v21 = vadd.f32 %v3772_v9, %v3770_v1  ;;  %2912 = vrcp.f32 %v1949_v31 }
 0x334   : > { %v2060_v59 = vmul.f32 %v2899_v18, %v3578_v8  ;;  %v2059_v60 = vmul.f32 %v2899_v18, %v3573_v5 }
 0x335   : > { %2005 = vadd.xlane.f32.xlu1 %v2004_v21 }
 0x336   : > { %v3780_v56 = vpop.eup %2900  ;;  %v2679_v20 = vpack.c.bf16 %v2060_v59, %v2058_v61  ;;  %v2182_v6 = vpop.xlane.xlu1 %2181  ;;  %v2681_v37 = vpack.c.bf16 %v2059_v60, %v2057_v44  ;;  %v543_v59 = vld [vmem:[%s3879_s10] sm:$0xf] }
 0x337   : > { %v3782_v14 = vpop.eup %2902  ;;  %v1952_v12 = vpop.xlane.xlu0 %1951  ;;  %v2183_v36 = vsub.f32 %v3300_v63, %v2182_v6 }
 0x338   : > { %2914 = vrcp.f32 %v1952_v12  ;;  %v2007_v17 = vadd.f32 %v3782_v14, %v3780_v56  ;;  %v2905_v8 = vpop.eup %2904  ;;  %2680 = vmatprep.subr.bf16.mxu0 %v2679_v20 }
 0x339   : > { %v3787_v13 = vpop.eup %2906  ;;  %v2184_v5 = vmul.f32 1.442695, %v2183_v36  ;;  %2682 = vmatpush1.bf16.xpose.msra.mxu0 %v2681_v37  ;;  %v2062_v63 = vmul.f32 %v2905_v8, %v3589_v4  ;;  %v2061_v55 = vmul.f32 %v2905_v8, %v3584_v23 }
 0x33a   : > { %2008 = vadd.xlane.f32.xlu0 %v2007_v17  ;;  %v3789_v45 = vpop.eup %2908  ;;  %v3966_v17 = vld [vmem:[#allocation7_spill] sm:$0xff] }
 0x33b   : > { %v1955_v42 = vpop.xlane.xlu0 %1954  ;;  %v2911_v39 = vpop.eup %2910  ;;  %2916 = vpow2.f32 %v2184_v5  ;;  %v2010_v48 = vadd.f32 %v3789_v45, %v3787_v13  ;;  %v3967_v5 = vld [vmem:[#allocation6_spill] sm:$0xff] }
 0x33c   : > { %v2064_v51 = vmul.f32 %v2911_v39, %v3600_v54  ;;  %v2063_v27 = vmul.f32 %v2911_v39, %v3595_v26  ;;  %2918 = vrcp.f32 %v1955_v42 }
 0x33d   : > { %2011 = vadd.xlane.f32.xlu1 %v2010_v48  ;;  %v2913_v49 = vpop.eup %2912 }
 0x33e   : > { %v1958_v57 = vpop.xlane.xlu1 %1957  ;;  %v2683_v58 = vpack.c.bf16 %v2064_v51, %v2062_v63  ;;  %v2685_v19 = vpack.c.bf16 %v2063_v27, %v2061_v55  ;;  %v2066_v41 = vmul.f32 %v2913_v49, %v3608_v38  ;;  %v2065_v23 = vmul.f32 %v2913_v49, %v3606_v29  ;;  %v3968_v27 = vld [vmem:[#allocation10_spill] sm:$0xff] }
 0x33f   : > { %2920 = vrcp.f32 %v1958_v57 }
 0x340   : > { %2684 = vmatprep.subr.bf16.mxu0 %v2683_v58  ;;  %v3969_v58 = vld [vmem:[#allocation12_spill] sm:$0xff] }
 0x341   : > { %2686 = vmatpush1.bf16.xpose.msra.mxu0 %v2685_v19  ;;  %v3970_v19 = vld [vmem:[#allocation11_spill] sm:$0xff] }
 0x342   : > { %v2915_v33 = vpop.eup %2914  ;;  %v1961_v30 = vpop.xlane.xlu0 %1960 }
 0x343   : > { %v2068_v4 = vmul.f32 %v2915_v33, %v3616_v40  ;;  %v2067_v54 = vmul.f32 %v2915_v33, %v3614_v47  ;;  %2922 = vrcp.f32 %v1961_v30  ;;  %v3971_v33 = vld [vmem:[#allocation9_spill] sm:$0xff] }
 0x345   : > { %v2687_v26 = vpack.c.bf16 %v2068_v4, %v2066_v41  ;;  %v3801_v24 = vpop.eup %2916  ;;  %v2689_v11 = vpack.c.bf16 %v2067_v54, %v2065_v23 }
 0x346   : > { %v1964_v31 = vpop.xlane.xlu1 %1963  ;;  %v2186_v18 = vsel %vm2179_vm2, %v3801_v24, 0.0  ;;  %v2919_v21 = vpop.eup %2918 }
 0x347   : > { %2688 = vmatprep.subr.bf16.mxu0 %v2687_v26  ;;  %2924 = vrcp.f32 %v1964_v31  ;;  %2187 = vadd.xlane.f32.xlu0 %v2186_v18  ;;  %v2070_v47 = vmul.f32 %v2919_v21, %v3626_v43  ;;  %v2069_v44 = vmul.f32 %v2919_v21, %v3624_v34 }
 0x349   : > { %v2921_v38 = vpop.eup %2920  ;;  %2690 = vmatpush1.bf16.xpose.msra.mxu0 %v2689_v11 }
 0x34a   : > { %v1967_v40 = vpop.xlane.xlu0 %1966  ;;  %v2072_v29 = vmul.f32 %v2921_v38, %v3634_v7  ;;  %v2071_v61 = vmul.f32 %v2921_v38, %v3632_v15  ;;  %v3965_v15 = vld [vmem:[#allocation8_spill] sm:$0xff] }
 0x34b   : > { %2926 = vrcp.f32 %v1967_v40 }
 0x34c   : > { %v2691_v60 = vpack.c.bf16 %v2072_v29, %v2070_v47  ;;  %v2693_v20 = vpack.c.bf16 %v2071_v61, %v2069_v44  ;;  %v3972_v44 = vld [vmem:[#allocation14_spill] sm:$0xff] }
 0x34d   : > { %v2923_v12 = vpop.eup %2922 }
 0x34e   : > { %v1970_v6 = vpop.xlane.xlu1 %1969  ;;  %789 = vperm.xlu1 %2760, %v543_v59   ;;  %2692 = vmatprep.subr.bf16.mxu0 %v2691_v60  ;;  %v2074_v7 = vmul.f32 %v2923_v12, %v3642_v50  ;;  %v2073_v42 = vmul.f32 %v2923_v12, %v3967_v5  ;;  %v3978_v5 = vld [vmem:[#allocation19_spill] sm:$0xff] }
 0x34f   : > { %2928 = vrcp.f32 %v1970_v6 }
 0x351   : > { %v2925_v37 = vpop.eup %2924  ;;  %2694 = vmatpush1.bf16.xpose.msra.mxu0 %v2693_v20  ;;  %v3973_v20 = vld [vmem:[#allocation16_spill] sm:$0xff] }
 0x352   : > { %v1973_v43 = vpop.xlane.xlu0 %1972  ;;  %v2076_v36 = vmul.f32 %v2925_v37, %v3965_v15  ;;  %v2075_v8 = vmul.f32 %v2925_v37, %v3966_v17  ;;  %v3976_v15 = vld [vmem:[#allocation18_spill] sm:$0xff]  ;;  %v3977_v17 = vld [vmem:[#allocation20_spill] sm:$0xff] }
 0x353   : > { %2930 = vrcp.f32 %v1973_v43 }
 0x354   : > { %v2695_v34 = vpack.c.bf16 %v2076_v36, %v2074_v7  ;;  %v2697_v39 = vpack.c.bf16 %v2075_v8, %v2073_v42 }
 0x355   : > { %v2927_v63 = vpop.eup %2926 }
 0x356   : > { %v1976_v48 = vpop.xlane.xlu1 %1975  ;;  %2696 = vmatprep.subr.bf16.mxu0 %v2695_v34  ;;  %v2078_v57 = vmul.f32 %v2927_v63, %v3968_v27  ;;  %v2077_v30 = vmul.f32 %v2927_v63, %v3971_v33  ;;  %v3979_v34 = vld [vmem:[#allocation17_spill] sm:$0xff] }
 0x357   : > { %2932 = vrcp.f32 %v1976_v48 }
 0x359   : > { %v2929_v51 = vpop.eup %2928  ;;  %2698 = vmatpush1.bf16.xpose.msra.mxu0 %v2697_v39 }
 0x35a   : > { %v1979_v55 = vpop.xlane.xlu0 %1978  ;;  %v2080_v50 = vmul.f32 %v2929_v51, %v3969_v58  ;;  %v2079_v49 = vmul.f32 %v2929_v51, %v3970_v19 }
 0x35b   : > { %2934 = vrcp.f32 %v1979_v55 }
 0x35c   : > { %v2699_v41 = vpack.c.bf16 %v2080_v50, %v2078_v57  ;;  %v2701_v4 = vpack.c.bf16 %v2079_v49, %v2077_v30 }
 0x35d   : > { %v2931_v23 = vpop.eup %2930 }
 0x35e   : > { %v1982_v54 = vpop.xlane.xlu1 %1981  ;;  %2700 = vmatprep.subr.bf16.mxu0 %v2699_v41  ;;  %v2082_v31 = vmul.f32 %v2931_v23, %v3674_v53  ;;  %v2081_v38 = vmul.f32 %v2931_v23, %v3672_v52  ;;  %v3974_v53 = vld [vmem:[#allocation15_spill] sm:$0xff] }
 0x35f   : > { %2936 = vrcp.f32 %v1982_v54 }
 0x361   : > { %v2933_v26 = vpop.eup %2932  ;;  %2702 = vmatpush1.bf16.xpose.msra.mxu0 %v2701_v4 }
 0x362   : > { %v1985_v11 = vpop.xlane.xlu0 %1984  ;;  %v2084_v18 = vmul.f32 %v2933_v26, %v3682_v28  ;;  %v2083_v21 = vmul.f32 %v2933_v26, %v3680_v25  ;;  %v3975_v28 = vld [vmem:[#allocation13_spill] sm:$0xff] }
 0x363   : > { %2938 = vrcp.f32 %v1985_v11 }
 0x364   : > { %v2703_v40 = vpack.c.bf16 %v2084_v18, %v2082_v31  ;;  %v2705_v47 = vpack.c.bf16 %v2083_v21, %v2081_v38 }
 0x365   : > { %v2935_v61 = vpop.eup %2934 }
 0x366   : > { %v1988_v29 = vpop.xlane.xlu1 %1987  ;;  %2704 = vmatprep.subr.bf16.mxu0 %v2703_v40  ;;  %v2086_v60 = vmul.f32 %v2935_v61, %v3972_v44  ;;  %v2085_v37 = vmul.f32 %v2935_v61, %v3975_v28  ;;  %v3981_v44 = vld [vmem:[#allocation4_spill] sm:$0xff] }
 0x367   : > { %2940 = vrcp.f32 %v1988_v29 }
 0x369   : > { %v2937_v59 = vpop.eup %2936  ;;  %2706 = vmatpush1.bf16.xpose.msra.mxu0 %v2705_v47 }
 0x36a   : > { %v2088_v6 = vmul.f32 %v2937_v59, %v3973_v20  ;;  %v2087_v12 = vmul.f32 %v2937_v59, %v3974_v53  ;;  %v3980_v59 = vld [vmem:[#allocation3_spill] sm:$0xff]  ;;  %v3982_v20 = vld [vmem:[#allocation5_spill] sm:$0xff] }
 0x36c   : > { %v2707_v25 = vpack.c.bf16 %v2088_v6, %v2086_v60  ;;  %v2709_v43 = vpack.c.bf16 %v2087_v12, %v2085_v37 }
 0x36d   : > { %v2939_v52 = vpop.eup %2938 }
 0x36e   : > { %2708 = vmatprep.subr.bf16.mxu0 %v2707_v25  ;;  %v2090_v36 = vmul.f32 %v2939_v52, %v3976_v15  ;;  %v2089_v39 = vmul.f32 %v2939_v52, %v3979_v34  ;;  %v3983_v15 = vld [vmem:[#allocation2_spill] sm:$0xff] }
 0x371   : > { %v2941_v7 = vpop.eup %2940  ;;  %2710 = vmatpush1.bf16.xpose.msra.mxu0 %v2709_v43 }
 0x372   : > { %v2092_v8 = vmul.f32 %v2941_v7, %v3977_v17  ;;  %v2091_v42 = vmul.f32 %v2941_v7, %v3978_v5 }
 0x374   : > { %v2711_v48 = vpack.c.bf16 %v2092_v8, %v2090_v36  ;;  %v2713_v63 = vpack.c.bf16 %v2091_v42, %v2089_v39 }
 0x376   : > { %2712 = vmatprep.subr.bf16.mxu0 %v2711_v48 }
 0x379   : > { %2714 = vmatpush1.bf16.xpose.msra.mxu0 %v2713_v63 }
 0x3ae   : > { %v1991_v51 = vpop.xlane.xlu0 %1990 }
 0x3af   : > { %2942 = vrcp.f32 %v1991_v51 }
 0x3b2   : > { %v1994_v55 = vpop.xlane.xlu1 %1993 }
 0x3b3   : > { %2944 = vrcp.f32 %v1994_v55 }
 0x3b6   : > { %v1997_v27 = vpop.xlane.xlu0 %1996 }
 0x3b7   : > { %2946 = vrcp.f32 %v1997_v27 }
 0x3b9   : > { %v2943_v58 = vpop.eup %2942 }
 0x3ba   : > { %v2000_v57 = vpop.xlane.xlu1 %1999  ;;  %v2094_v49 = vmul.f32 %v2943_v58, %v3726_v0  ;;  %v2093_v30 = vmul.f32 %v2943_v58, %v3724_v35 }
 0x3bb   : > { %2948 = vrcp.f32 %v2000_v57 }
 0x3bd   : > { %v2945_v50 = vpop.eup %2944 }
 0x3be   : > { %v2096_v33 = vmul.f32 %v2945_v50, %v3734_v46  ;;  %v2095_v41 = vmul.f32 %v2945_v50, %v3732_v22 }
 0x3bf   : > { %v2003_v19 = vpop.xlane.xlu0 %2002 }
 0x3c0   : > { %v2715_v4 = vpack.c.bf16 %v2096_v33, %v2094_v49  ;;  %v2717_v54 = vpack.c.bf16 %v2095_v41, %v2093_v30  ;;  %2950 = vrcp.f32 %v2003_v19 }
 0x3c1   : > { %v2947_v26 = vpop.eup %2946 }
 0x3c2   : > { %v2006_v23 = vpop.xlane.xlu1 %2005  ;;  %2716 = vmatprep.subr.bf16.mxu0 %v2715_v4  ;;  %v2098_v18 = vmul.f32 %v2947_v26, %v3746_v32  ;;  %v2097_v46 = vmul.f32 %v2947_v26, %v3744_v10 }
 0x3c3   : > { %2952 = vrcp.f32 %v2006_v23  ;;  %2718 = vmatpush1.bf16.xpose.msra.mxu0 %v2717_v54 }
 0x3c5   : > { %v2949_v11 = vpop.eup %2948 }
 0x3c6   : > { %v2100_v0 = vmul.f32 %v2949_v11, %v3754_v16  ;;  %v2099_v35 = vmul.f32 %v2949_v11, %v3752_v3 }
 0x3c7   : > { %v2009_v31 = vpop.xlane.xlu0 %2008 }
 0x3c8   : > { %v2719_v21 = vpack.c.bf16 %v2100_v0, %v2098_v18  ;;  %v2721_v22 = vpack.c.bf16 %v2099_v35, %v2097_v46  ;;  %2954 = vrcp.f32 %v2009_v31 }
 0x3ca   : > { %v2012_v38 = vpop.xlane.xlu1 %2011  ;;  %2720 = vmatprep.subr.bf16.mxu0 %v2719_v21  ;;  %v2951_v40 = vpop.eup %2950 }
 0x3cb   : > { %2956 = vrcp.f32 %v2012_v38  ;;  %2722 = vmatpush1.bf16.xpose.msra.mxu0 %v2721_v22  ;;  %v2102_v61 = vmul.f32 %v2951_v40, %v3766_v2  ;;  %v2101_v16 = vmul.f32 %v2951_v40, %v3764_v62 }
 0x3cd   : > { %v2953_v47 = vpop.eup %2952 }
 0x3ce   : > { %v790_v29 = vpop.permute.xlu1 %789  ;;  %v2104_v32 = vmul.f32 %v2953_v47, %v3772_v9  ;;  %v2103_v10 = vmul.f32 %v2953_v47, %v3770_v1 }
 0x3cf   : > { %v864_v3 = vadd.f32 %v3980_v59, %v790_v29  ;;  %v939_v60 = vadd.f32 %v3981_v44, %v790_v29  ;;  %v941_v6 = vadd.f32 %v3982_v20, %v790_v29  ;;  %v862_v36 = vadd.f32 %v3983_v15, %v790_v29 }
 0x3d0   : > { %v2723_v53 = vpack.c.bf16 %v2104_v32, %v2102_v61  ;;  %v2725_v12 = vpack.c.bf16 %v2103_v10, %v2101_v16 }
 0x3d1   : > { %2574 = vmatprep.subr.msk.mxu1 %vm555_vm0, %v941_v6  ;;  %2335 = vmatprep.mubr.f32.mxu0 %v864_v3 }
 0x3d2   : > { %2575 = vmatpush1.msk.msra.mxu1 %vm555_vm0, %v939_v60  ;;  %2724 = vmatprep.subr.bf16.mxu0 %v2723_v53  ;;  %v2955_v2 = vpop.eup %2954 }
 0x3d3   : > { %2726 = vmatpush1.bf16.xpose.msra.mxu0 %v2725_v12  ;;  %v2106_v1 = vmul.f32 %v2955_v2, %v3782_v14  ;;  %v2105_v37 = vmul.f32 %v2955_v2, %v3780_v56 }
 0x3d4   : > { %v2188_v9 = vpop.xlane.xlu0 %2187 }
 0x3d5   : > { %v2957_v62 = vpop.eup %2956  ;;  %2958 = vrcp.f32 %v2188_v9 }
 0x3d6   : > { %v2108_v28 = vmul.f32 %v2957_v62, %v3789_v45  ;;  %v2107_v25 = vmul.f32 %v2957_v62, %v3787_v13 }
 0x3d8   : > { %v2727_v43 = vpack.c.bf16 %v2108_v28, %v2106_v1  ;;  %v2729_v52 = vpack.c.bf16 %v2107_v25, %v2105_v37 }
 0x3da   : > { %2728 = vmatprep.subr.bf16.mxu0 %v2727_v43 }
 0x3db   : > { %2730 = vmatpush1.bf16.xpose.msra.mxu0 %v2729_v52 }
 0x3df   : > { %v2959_v7 = vpop.eup %2958 }
 0x3e0   : > { %v2190_v17 = vmul.f32 %v2959_v7, %v3801_v24 }
 0x3e2   : > { %2336 = vmatmul.mubr.f32.vlgmr.msra.gmra.mrb[64].mxu0 %v862_v36  ;;  %2576 = vmatmul.mubr.msk.f32.vlgmr.msra.gmra.mrb[44].mxu1 %vm551_vm1, %v2190_v17 }
 0x4b5   : > { %v2337_v14 = vpop.f32.mrb[64].mxu0  ;;  %v2266_v8 = vpop.f32.mrb[44].mxu1 }
 0x4b6   : > { %v2338_v45 = vadd.f32 %v2337_v14, %v2266_v8  ;;  %v2339_v5 = vpop.f32.mrb[65].mxu0  ;;  %v2268_v56 = vpop.f32.mrb[45].mxu1 }
 0x4b7   : > { %v2340_v42 = vadd.f32 %v2339_v5, %v2268_v56 }
 0x4b9   : > { %v2344_v13 = vcombine.low %v2338_v45, %v2340_v42 }
 0x4bb   : > { %2346 = vst [vmem:[%s500_s21] sm:$0xff] %v2344_v13 }
 0x4bc PF: > { %s21_s19 = sadd.s32 1, %s2982_s19   ;;  %s3984_s17 = smov %s2978_s18 }
 0x4bd   : > { %p18_p5 = scmp.ge.s32.totalorder %s21_s19, 4   ;;  %s3985_s18 = smov %s3987_s20 }
 0x4bf   :  { %20 = sbr.rel (!%p18_p5) target bundleno = 2 (0x2), region = 103 }

</bundles_post_ra>
